<compile_context>
chip_gen: v7x
topology: tpu7x:2x2x1
jax: 0.10.0
libtpu: 0.0.40
codegen_flags: <defaults>
</compile_context>

<pallas_src>
import jax
import jax.numpy as jnp
from jax.experimental import pallas as pl
from jax.experimental.pallas import tpu as pltpu


# --------------------------- fused encoder+decoder kernel ---------------------------

def _spelling_corrector_kernel(lens_ref,               # SMEM (B,) i32, scalar prefetch
                               x_ref,                  # (BB, T, D_in) bf16
                               emb_ref,                # (BB, U, H)    bf16 (gathered)
                               enc_w_ref,              # (D_in, H)     bf16
                               enc_b_ref,              # (1, H)        f32
                               wc1_ref,                # (H, H)        bf16  (emb path)
                               wc2_ref,                # (H, H)        bf16  (ctx path)
                               bc_ref,                 # (1, H)        f32
                               wo_ref,                 # (H, V)        bf16
                               bo_ref,                 # (1, V)        f32
                               out_ref):               # (BB, U, V)    f32
    blk = pl.program_id(0)
    BB, T, D_in = x_ref.shape
    _, U, H = emb_ref.shape
    V = out_ref.shape[-1]

    # ---------------- encoder: tanh(x @ W_enc + b_enc), rows stacked across BB ----------------
    x2 = x_ref[...].reshape(BB * T, D_in)                                # bf16, M = BB*T
    enc_bf = jnp.tanh(
        jnp.dot(x2, enc_w_ref[...], preferred_element_type=jnp.float32)
        + enc_b_ref[...]).astype(jnp.bfloat16)                           # (BB*T, H) bf16 directly
    enc_bf = enc_bf.reshape(BB, T, H)

    # ---------------- decoder: length-masked scaled dot-product attention ----------------
    emb_bf = emb_ref[...]                                                # (BB, U, H) bf16
    scale = jnp.asarray(1.0 / (H ** 0.5), dtype=jnp.bfloat16)
    q_bf = emb_bf * scale                                                # scale folded into query

    # scores[b] = q[b] @ enc[b].T   (batched over BB inside the block)
    scores = jnp.einsum('bud,btd->but', q_bf, enc_bf,
                        preferred_element_type=jnp.float32)              # (BB, U, T) f32

    # mask padded encoder timesteps (t >= input_length[b]); lengths live in SMEM
    t_idx = jax.lax.broadcasted_iota(jnp.int32, scores.shape, 2)
    b_idx = jax.lax.broadcasted_iota(jnp.int32, scores.shape, 0)
    lens_b = jnp.zeros(scores.shape, jnp.int32)
    for i in range(BB):                                                  # static unroll, BB small
        lens_b = jnp.where(b_idx == i, lens_ref[blk * BB + i], lens_b)
    scores = jnp.where(t_idx < lens_b, scores, jnp.float32(-1e30))

    # numerically stable softmax over encoder timesteps (f32 path, EUP reciprocal)
    scores = scores - jnp.max(scores, axis=-1, keepdims=True)
    p = jnp.exp(scores)
    inv_den = pl.reciprocal(jnp.sum(p, axis=-1, keepdims=True), approx=True)
    attn = (p * inv_den).astype(jnp.bfloat16)                            # (BB, U, T) bf16

    ctx = jnp.einsum('but,btd->bud', attn, enc_bf,
                     preferred_element_type=jnp.float32)                 # (BB, U, H) f32

    # ---------------- combine: tanh(emb @ Wc1 + ctx @ Wc2 + bc), M = BB*U ----------------
    emb2 = emb_bf.reshape(BB * U, H)                                     # bf16
    ctx2 = ctx.reshape(BB * U, H).astype(jnp.bfloat16)
    comb = jnp.tanh(
        jnp.dot(emb2, wc1_ref[...], preferred_element_type=jnp.float32)
        + jnp.dot(ctx2, wc2_ref[...], preferred_element_type=jnp.float32)
        + bc_ref[...])                                                   # (BB*U, H) f32

    # ---------------- output projection to vocab logits (lane-dense V) ----------------
    logits = (jnp.dot(comb.astype(jnp.bfloat16), wo_ref[...],
                      preferred_element_type=jnp.float32)
              + bo_ref[...])                                             # (BB*U, V) f32
    out_ref[...] = logits.reshape(BB, U, V)


# ----------------------------- wrapper -----------------------------

def _pick_block_batch(B, T, D_in, U, H, V, vmem_budget=24 * 1024 * 1024):
    """Largest BB dividing B that keeps >=2 grid steps (v7x megacore) and fits VMEM."""
    # double-buffered per-batch streams (bf16 x, bf16 emb, f32 out) + rough intermediates
    per_batch = (2 * (T * D_in * 2 + U * H * 2 + U * V * 4)
                 + T * H * 2 + 3 * U * T * 4 + U * H * 4 + U * V * 4)
    best = 1
    for cand in range(1, B + 1):
        if B % cand != 0:
            continue
        if B >= 2 and (B // cand) < 2:
            continue                       # keep grid >= 2 so both v7x TCs get work
        if cand * per_batch > vmem_budget:
            continue
        best = cand
    return best


def spelling_corrector_forward(input_lengths, inputs, dec_emb,
                               enc_w, enc_b, wc1, wc2, bc, wo, bo):
    B, T, D_in = inputs.shape
    _, U, H = dec_emb.shape
    V = wo.shape[1]
    BB = _pick_block_batch(B, T, D_in, U, H, V)

    # Advisory cost hint for XLA scheduling around the custom call.
    flops = int(B * 2 * (T * D_in * H          # encoder projection
                         + 2 * U * T * H       # attention scores + context
                         + 2 * U * H * H       # combine (two HxH matmuls)
                         + U * H * V))         # output projection
    transcendentals = int(B * (T * H + U * H + U * T))
    bytes_accessed = int(input_lengths.size * 4
                         + inputs.size * 2 + dec_emb.size * 2
                         + enc_w.size * 2 + enc_b.size * 4
                         + wc1.size * 2 + wc2.size * 2 + bc.size * 4
                         + wo.size * 2 + bo.size * 4
                         + B * U * V * 4)
    cost = pl.CostEstimate(flops=flops, transcendentals=transcendentals,
                           bytes_accessed=bytes_accessed)

    grid_spec = pltpu.PrefetchScalarGridSpec(
        num_scalar_prefetch=1,          # input_lengths -> SMEM
        grid=(B // BB,),
        in_specs=[
            pl.BlockSpec((BB, T, D_in), lambda b, lens: (b, 0, 0)),
            pl.BlockSpec((BB, U, H),    lambda b, lens: (b, 0, 0)),
            pl.BlockSpec((D_in, H),     lambda b, lens: (0, 0)),
            pl.BlockSpec((1, H),        lambda b, lens: (0, 0)),
            pl.BlockSpec((H, H),        lambda b, lens: (0, 0)),
            pl.BlockSpec((H, H),        lambda b, lens: (0, 0)),
            pl.BlockSpec((1, H),        lambda b, lens: (0, 0)),
            pl.BlockSpec((H, V),        lambda b, lens: (0, 0)),
            pl.BlockSpec((1, V),        lambda b, lens: (0, 0)),
        ],
        out_specs=pl.BlockSpec((BB, U, V), lambda b, lens: (b, 0, 0)),
    )

    return pl.pallas_call(
        _spelling_corrector_kernel,
        out_shape=jax.ShapeDtypeStruct((B, U, V), jnp.float32),
        grid_spec=grid_spec,
        compiler_params=pltpu.CompilerParams(
            dimension_semantics=("parallel",)),     # batch blocks split across TCs
        cost_estimate=cost,
    )(input_lengths, inputs, dec_emb, enc_w, enc_b, wc1, wc2, bc, wo, bo)


class SpellingCorrectorPallas:
    """forward(inputs, targets) = decoder(targets, encoder(inputs))."""

    def __init__(self, d_in, hidden, vocab, key):
        ks = jax.random.split(key, 5)
        s = 0.05
        # MXU-facing weights & streamed activations stored in bf16; accumulation is f32 in-kernel.
        self.enc_w = (jax.random.normal(ks[0], (d_in, hidden)) * s).astype(jnp.bfloat16)
        self.enc_b = jnp.zeros((1, hidden), jnp.float32)
        self.emb = (jax.random.normal(ks[1], (vocab, hidden)) * s).astype(jnp.bfloat16)
        # combine kept as two (H,H) blocks: comb = tanh(emb @ wc1 + ctx @ wc2 + bc)
        # (== concat([emb, ctx], -1) @ vstack([wc1, wc2]) + bc)
        self.wc1 = (jax.random.normal(ks[2], (hidden, hidden)) * s).astype(jnp.bfloat16)
        self.wc2 = (jax.random.normal(ks[3], (hidden, hidden)) * s).astype(jnp.bfloat16)
        self.bc = jnp.zeros((1, hidden), jnp.float32)
        self.wo = (jax.random.normal(ks[4], (hidden, vocab)) * s).astype(jnp.bfloat16)
        self.bo = jnp.zeros((1, vocab), jnp.float32)
        self.vocab = vocab

    def forward(self, inputs, targets, input_lengths=None):
        B, T, _ = inputs.shape
        if input_lengths is None:
            input_lengths = jnp.full((B,), T, dtype=jnp.int32)
        # guard degenerate all-masked softmax: at least one valid encoder step
        input_lengths = jnp.maximum(input_lengths.astype(jnp.int32), 1)
        # stream speech features as bf16 (one-time cast if caller hands f32)
        if inputs.dtype != jnp.bfloat16:
            inputs = inputs.astype(jnp.bfloat16)
        # token embedding is a real gather (bf16, no one-hot matmul)
        dec_emb = jnp.take(self.emb, targets, axis=0)        # (B, U, H) bf16
        return spelling_corrector_forward(
            input_lengths, inputs, dec_emb,
            self.enc_w, self.enc_b, self.wc1, self.wc2, self.bc, self.wo, self.bo)


if __name__ == "__main__":
    # Lane/sublane-friendly small shapes: feature/hidden/vocab multiples of 128, U multiple of 8.
    B, T, D_IN, H, U, V = 8, 128, 128, 128, 16, 256

    key = jax.random.PRNGKey(0)
    k_in, k_tgt, k_par = jax.random.split(key, 3)

    inputs = jax.random.normal(k_in, (B, T, D_IN), dtype=jnp.float32)
    targets = jax.random.randint(k_tgt, (B, U), 0, V, dtype=jnp.int32)
    input_lengths = jnp.array([T, T - 32, T, 64, T, 100, 77, T], dtype=jnp.int32)

    model = SpellingCorrectorPallas(D_IN, H, V, k_par)
    out = model.forward(inputs, targets, input_lengths)
    out = jax.block_until_ready(out)

    assert out.shape == (B, U, V) and out.dtype == jnp.float32
    assert bool(jnp.all(jnp.isfinite(out)))
    print("KERNEL_OK")
</pallas_src>

<mosaic_0001>
module attributes {stable_mosaic.version = 11 : i64} {
  func.func @_spelling_corrector_kernel(%arg0: i32, %arg1: memref<8xi32, #tpu.memory_space<smem>>, %arg2: memref<4x128x128xbf16, #tpu.memory_space<vmem>>, %arg3: memref<4x16x128xbf16, #tpu.memory_space<vmem>>, %arg4: memref<128x128xbf16, #tpu.memory_space<vmem>>, %arg5: memref<1x128xf32, #tpu.memory_space<vmem>>, %arg6: memref<128x128xbf16, #tpu.memory_space<vmem>>, %arg7: memref<128x128xbf16, #tpu.memory_space<vmem>>, %arg8: memref<1x128xf32, #tpu.memory_space<vmem>>, %arg9: memref<128x256xbf16, #tpu.memory_space<vmem>>, %arg10: memref<1x256xf32, #tpu.memory_space<vmem>>, %arg11: memref<4x16x256xf32, #tpu.memory_space<vmem>>) attributes {dimension_semantics = [#tpu.dimension_semantics<parallel>], iteration_bounds = array<i64: 2>, scalar_prefetch = 1 : i64, scratch_operands = 0 : i64, tpu.core_type = #tpu.core_type<tc>, window_params = [{transform_indices = @transform_0, window_bounds = array<i64: 4, 128, 128>}, {transform_indices = @transform_1, window_bounds = array<i64: 4, 16, 128>}, {pipeline_mode = #tpu.pipeline_mode<synchronous>, transform_indices = @transform_2, window_bounds = array<i64: 128, 128>}, {pipeline_mode = #tpu.pipeline_mode<synchronous>, transform_indices = @transform_3, window_bounds = array<i64: 1, 128>}, {pipeline_mode = #tpu.pipeline_mode<synchronous>, transform_indices = @transform_4, window_bounds = array<i64: 128, 128>}, {pipeline_mode = #tpu.pipeline_mode<synchronous>, transform_indices = @transform_5, window_bounds = array<i64: 128, 128>}, {pipeline_mode = #tpu.pipeline_mode<synchronous>, transform_indices = @transform_6, window_bounds = array<i64: 1, 128>}, {pipeline_mode = #tpu.pipeline_mode<synchronous>, transform_indices = @transform_7, window_bounds = array<i64: 128, 256>}, {pipeline_mode = #tpu.pipeline_mode<synchronous>, transform_indices = @transform_8, window_bounds = array<i64: 1, 256>}, {transform_indices = @transform_9, window_bounds = array<i64: 4, 16, 256>}]} {
    %c0 = arith.constant 0 : index
    %c0_0 = arith.constant 0 : index
    %c0_1 = arith.constant 0 : index
    %0 = vector.load %arg2[%c0, %c0_0, %c0_1] : memref<4x128x128xbf16, #tpu.memory_space<vmem>>, vector<4x128x128xbf16>
    %1 = vector.shape_cast %0 : vector<4x128x128xbf16> to vector<512x128xbf16>
    %c0_2 = arith.constant 0 : index
    %c0_3 = arith.constant 0 : index
    %2 = vector.load %arg4[%c0_2, %c0_3] : memref<128x128xbf16, #tpu.memory_space<vmem>>, vector<128x128xbf16>
    %cst = arith.constant dense<0.000000e+00> : vector<512x128xf32>
    %3 = tpu.matmul %1, %2, %cst {dimension_numbers = #tpu.dot_dimension_numbers<[1], [0], [0], [1], [0, 0, 1, 1], [], []>} : vector<512x128xbf16>, vector<128x128xbf16>, vector<512x128xf32> -> vector<512x128xf32>
    %c0_4 = arith.constant 0 : index
    %c0_5 = arith.constant 0 : index
    %4 = vector.load %arg5[%c0_4, %c0_5] : memref<1x128xf32, #tpu.memory_space<vmem>>, vector<1x128xf32>
    %5 = vector.broadcast %4 : vector<1x128xf32> to vector<512x128xf32>
    %6 = arith.addf %3, %5 : vector<512x128xf32>
    %7 = math.tanh %6 : vector<512x128xf32>
    %8 = arith.truncf %7 : vector<512x128xf32> to vector<512x128xbf16>
    %9 = vector.shape_cast %8 : vector<512x128xbf16> to vector<4x128x128xbf16>
    %c0_6 = arith.constant 0 : index
    %c0_7 = arith.constant 0 : index
    %c0_8 = arith.constant 0 : index
    %10 = vector.load %arg3[%c0_6, %c0_7, %c0_8] : memref<4x16x128xbf16, #tpu.memory_space<vmem>>, vector<4x16x128xbf16>
    %cst_9 = arith.constant 8.837890e-02 : bf16
    %11 = vector.broadcast %cst_9 : bf16 to vector<4x16x128xbf16>
    %12 = arith.mulf %10, %11 : vector<4x16x128xbf16>
    "tpu.trace_start"() <{level = 10 : i32, message = "bud,btd->but"}> : () -> ()
    %cst_10 = arith.constant dense<0.000000e+00> : vector<4x16x128xf32>
    %13 = tpu.matmul %12, %9, %cst_10 {dimension_numbers = #tpu.dot_dimension_numbers<[2], [2], [1], [1], [0, 0, 0, 1, 1, 1], [0], [0]>} : vector<4x16x128xbf16>, vector<4x128x128xbf16>, vector<4x16x128xf32> -> vector<4x16x128xf32>
    "tpu.trace_stop"() : () -> ()
    %14 = tpu.iota {dimensions = array<i32: 2>} : vector<4x16x128xi32>
    %15 = tpu.iota {dimensions = array<i32: 0>} : vector<4x16x128xi32>
    %c0_i32 = arith.constant 0 : i32
    %16 = vector.broadcast %c0_i32 : i32 to vector<4x16x128xi32>
    %c0_i32_11 = arith.constant 0 : i32
    %17 = vector.broadcast %c0_i32_11 : i32 to vector<4x16x128xi32>
    %18 = arith.cmpi eq, %15, %17 : vector<4x16x128xi32>
    %c4_i32 = arith.constant 4 : i32
    %19 = arith.muli %arg0, %c4_i32 : i32
    %c0_i32_12 = arith.constant 0 : i32
    %20 = arith.addi %19, %c0_i32_12 : i32
    %21 = arith.index_cast %20 : i32 to index
    %22 = memref.load %arg1[%21] : memref<8xi32, #tpu.memory_space<smem>>
    %23 = vector.broadcast %22 : i32 to vector<4x16x128xi32>
    %24 = arith.select %18, %23, %16 : vector<4x16x128xi1>, vector<4x16x128xi32>
    %c1_i32 = arith.constant 1 : i32
    %25 = vector.broadcast %c1_i32 : i32 to vector<4x16x128xi32>
    %26 = arith.cmpi eq, %15, %25 : vector<4x16x128xi32>
    %c4_i32_13 = arith.constant 4 : i32
    %27 = arith.muli %arg0, %c4_i32_13 : i32
    %c1_i32_14 = arith.constant 1 : i32
    %28 = arith.addi %27, %c1_i32_14 : i32
    %29 = arith.index_cast %28 : i32 to index
    %30 = memref.load %arg1[%29] : memref<8xi32, #tpu.memory_space<smem>>
    %31 = vector.broadcast %30 : i32 to vector<4x16x128xi32>
    %32 = arith.select %26, %31, %24 : vector<4x16x128xi1>, vector<4x16x128xi32>
    %c2_i32 = arith.constant 2 : i32
    %33 = vector.broadcast %c2_i32 : i32 to vector<4x16x128xi32>
    %34 = arith.cmpi eq, %15, %33 : vector<4x16x128xi32>
    %c4_i32_15 = arith.constant 4 : i32
    %35 = arith.muli %arg0, %c4_i32_15 : i32
    %c2_i32_16 = arith.constant 2 : i32
    %36 = arith.addi %35, %c2_i32_16 : i32
    %37 = arith.index_cast %36 : i32 to index
    %38 = memref.load %arg1[%37] : memref<8xi32, #tpu.memory_space<smem>>
    %39 = vector.broadcast %38 : i32 to vector<4x16x128xi32>
    %40 = arith.select %34, %39, %32 : vector<4x16x128xi1>, vector<4x16x128xi32>
    %c3_i32 = arith.constant 3 : i32
    %41 = vector.broadcast %c3_i32 : i32 to vector<4x16x128xi32>
    %42 = arith.cmpi eq, %15, %41 : vector<4x16x128xi32>
    %c4_i32_17 = arith.constant 4 : i32
    %43 = arith.muli %arg0, %c4_i32_17 : i32
    %c3_i32_18 = arith.constant 3 : i32
    %44 = arith.addi %43, %c3_i32_18 : i32
    %45 = arith.index_cast %44 : i32 to index
    %46 = memref.load %arg1[%45] : memref<8xi32, #tpu.memory_space<smem>>
    %47 = vector.broadcast %46 : i32 to vector<4x16x128xi32>
    %48 = arith.select %42, %47, %40 : vector<4x16x128xi1>, vector<4x16x128xi32>
    %49 = arith.cmpi slt, %14, %48 : vector<4x16x128xi32>
    %cst_19 = arith.constant -1.000000e+30 : f32
    %50 = vector.broadcast %cst_19 : f32 to vector<4x16x128xf32>
    %51 = arith.select %49, %13, %50 : vector<4x16x128xi1>, vector<4x16x128xf32>
    %cst_20 = arith.constant dense<0xFF800000> : vector<4x16xf32>
    %52 = vector.multi_reduction <maximumf>, %51, %cst_20 [2] : vector<4x16x128xf32> to vector<4x16xf32>
    %53 = vector.shape_cast %52 : vector<4x16xf32> to vector<4x16x1xf32>
    %54 = vector.broadcast %53 : vector<4x16x1xf32> to vector<4x16x128xf32>
    %55 = arith.subf %51, %54 : vector<4x16x128xf32>
    %56 = math.exp %55 : vector<4x16x128xf32>
    %cst_21 = arith.constant dense<0.000000e+00> : vector<4x16xf32>
    %57 = vector.multi_reduction <add>, %56, %cst_21 [2] : vector<4x16x128xf32> to vector<4x16xf32>
    %58 = vector.shape_cast %57 : vector<4x16xf32> to vector<4x16x1xf32>
    %59 = tpu.reciprocal %58 {approx = true} : vector<4x16x1xf32> -> vector<4x16x1xf32>
    %60 = vector.broadcast %59 : vector<4x16x1xf32> to vector<4x16x128xf32>
    %61 = arith.mulf %56, %60 : vector<4x16x128xf32>
    %62 = arith.truncf %61 : vector<4x16x128xf32> to vector<4x16x128xbf16>
    "tpu.trace_start"() <{level = 10 : i32, message = "but,btd->bud"}> : () -> ()
    %cst_22 = arith.constant dense<0.000000e+00> : vector<4x16x128xf32>
    %63 = tpu.matmul %62, %9, %cst_22 {dimension_numbers = #tpu.dot_dimension_numbers<[2], [1], [1], [2], [0, 0, 0, 1, 1, 2], [0], [0]>} : vector<4x16x128xbf16>, vector<4x128x128xbf16>, vector<4x16x128xf32> -> vector<4x16x128xf32>
    "tpu.trace_stop"() : () -> ()
    %64 = vector.shape_cast %10 : vector<4x16x128xbf16> to vector<64x128xbf16>
    %65 = vector.shape_cast %63 : vector<4x16x128xf32> to vector<64x128xf32>
    %66 = arith.truncf %65 : vector<64x128xf32> to vector<64x128xbf16>
    %c0_23 = arith.constant 0 : index
    %c0_24 = arith.constant 0 : index
    %67 = vector.load %arg6[%c0_23, %c0_24] : memref<128x128xbf16, #tpu.memory_space<vmem>>, vector<128x128xbf16>
    %cst_25 = arith.constant dense<0.000000e+00> : vector<64x128xf32>
    %68 = tpu.matmul %64, %67, %cst_25 {dimension_numbers = #tpu.dot_dimension_numbers<[1], [0], [0], [1], [0, 0, 1, 1], [], []>} : vector<64x128xbf16>, vector<128x128xbf16>, vector<64x128xf32> -> vector<64x128xf32>
    %c0_26 = arith.constant 0 : index
    %c0_27 = arith.constant 0 : index
    %69 = vector.load %arg7[%c0_26, %c0_27] : memref<128x128xbf16, #tpu.memory_space<vmem>>, vector<128x128xbf16>
    %cst_28 = arith.constant dense<0.000000e+00> : vector<64x128xf32>
    %70 = tpu.matmul %66, %69, %cst_28 {dimension_numbers = #tpu.dot_dimension_numbers<[1], [0], [0], [1], [0, 0, 1, 1], [], []>} : vector<64x128xbf16>, vector<128x128xbf16>, vector<64x128xf32> -> vector<64x128xf32>
    %71 = arith.addf %68, %70 : vector<64x128xf32>
    %c0_29 = arith.constant 0 : index
    %c0_30 = arith.constant 0 : index
    %72 = vector.load %arg8[%c0_29, %c0_30] : memref<1x128xf32, #tpu.memory_space<vmem>>, vector<1x128xf32>
    %73 = vector.broadcast %72 : vector<1x128xf32> to vector<64x128xf32>
    %74 = arith.addf %71, %73 : vector<64x128xf32>
    %75 = math.tanh %74 : vector<64x128xf32>
    %76 = arith.truncf %75 : vector<64x128xf32> to vector<64x128xbf16>
    %c0_31 = arith.constant 0 : index
    %c0_32 = arith.constant 0 : index
    %77 = vector.load %arg9[%c0_31, %c0_32] : memref<128x256xbf16, #tpu.memory_space<vmem>>, vector<128x256xbf16>
    %cst_33 = arith.constant dense<0.000000e+00> : vector<64x256xf32>
    %78 = tpu.matmul %76, %77, %cst_33 {dimension_numbers = #tpu.dot_dimension_numbers<[1], [0], [0], [1], [0, 0, 1, 1], [], []>} : vector<64x128xbf16>, vector<128x256xbf16>, vector<64x256xf32> -> vector<64x256xf32>
    %c0_34 = arith.constant 0 : index
    %c0_35 = arith.constant 0 : index
    %79 = vector.load %arg10[%c0_34, %c0_35] : memref<1x256xf32, #tpu.memory_space<vmem>>, vector<1x256xf32>
    %80 = vector.broadcast %79 : vector<1x256xf32> to vector<64x256xf32>
    %81 = arith.addf %78, %80 : vector<64x256xf32>
    %82 = vector.shape_cast %81 : vector<64x256xf32> to vector<4x16x256xf32>
    %c0_36 = arith.constant 0 : index
    %c0_37 = arith.constant 0 : index
    %c0_38 = arith.constant 0 : index
    %83 = vector.load %arg11[%c0_36, %c0_37, %c0_38] : memref<4x16x256xf32, #tpu.memory_space<vmem>>, vector<4x16x256xf32>
    tpu.vector_store %arg11[%c0_36, %c0_37, %c0_38], %82 {strides = array<i32>} : memref<4x16x256xf32, #tpu.memory_space<vmem>>, vector<4x16x256xf32>,
    return
  }
  func.func @transform_0(%arg0: i32, %arg1: memref<8xi32, #tpu.memory_space<smem>>) -> (i32, i32, i32) {
    %c0_i32 = arith.constant 0 : i32
    %c0_i32_0 = arith.constant 0 : i32
    %c0_i32_1 = arith.constant 0 : i32
    return %arg0, %c0_i32, %c0_i32_0 : i32, i32, i32
  }
  func.func @transform_1(%arg0: i32, %arg1: memref<8xi32, #tpu.memory_space<smem>>) -> (i32, i32, i32) {
    %c0_i32 = arith.constant 0 : i32
    %c0_i32_0 = arith.constant 0 : i32
    %c0_i32_1 = arith.constant 0 : i32
    return %arg0, %c0_i32, %c0_i32_0 : i32, i32, i32
  }
  func.func @transform_2(%arg0: i32, %arg1: memref<8xi32, #tpu.memory_space<smem>>) -> (i32, i32) {
    %c0_i32 = arith.constant 0 : i32
    %c0_i32_0 = arith.constant 0 : i32
    %c0_i32_1 = arith.constant 0 : i32
    return %c0_i32, %c0_i32_0 : i32, i32
  }
  func.func @transform_3(%arg0: i32, %arg1: memref<8xi32, #tpu.memory_space<smem>>) -> (i32, i32) {
    %c0_i32 = arith.constant 0 : i32
    %c0_i32_0 = arith.constant 0 : i32
    %c0_i32_1 = arith.constant 0 : i32
    return %c0_i32, %c0_i32_0 : i32, i32
  }
  func.func @transform_4(%arg0: i32, %arg1: memref<8xi32, #tpu.memory_space<smem>>) -> (i32, i32) {
    %c0_i32 = arith.constant 0 : i32
    %c0_i32_0 = arith.constant 0 : i32
    %c0_i32_1 = arith.constant 0 : i32
    return %c0_i32, %c0_i32_0 : i32, i32
  }
  func.func @transform_5(%arg0: i32, %arg1: memref<8xi32, #tpu.memory_space<smem>>) -> (i32, i32) {
    %c0_i32 = arith.constant 0 : i32
    %c0_i32_0 = arith.constant 0 : i32
    %c0_i32_1 = arith.constant 0 : i32
    return %c0_i32, %c0_i32_0 : i32, i32
  }
  func.func @transform_6(%arg0: i32, %arg1: memref<8xi32, #tpu.memory_space<smem>>) -> (i32, i32) {
    %c0_i32 = arith.constant 0 : i32
    %c0_i32_0 = arith.constant 0 : i32
    %c0_i32_1 = arith.constant 0 : i32
    return %c0_i32, %c0_i32_0 : i32, i32
  }
  func.func @transform_7(%arg0: i32, %arg1: memref<8xi32, #tpu.memory_space<smem>>) -> (i32, i32) {
    %c0_i32 = arith.constant 0 : i32
    %c0_i32_0 = arith.constant 0 : i32
    %c0_i32_1 = arith.constant 0 : i32
    return %c0_i32, %c0_i32_0 : i32, i32
  }
  func.func @transform_8(%arg0: i32, %arg1: memref<8xi32, #tpu.memory_space<smem>>) -> (i32, i32) {
    %c0_i32 = arith.constant 0 : i32
    %c0_i32_0 = arith.constant 0 : i32
    %c0_i32_1 = arith.constant 0 : i32
    return %c0_i32, %c0_i32_0 : i32, i32
  }
  func.func @transform_9(%arg0: i32, %arg1: memref<8xi32, #tpu.memory_space<smem>>) -> (i32, i32, i32) {
    %c0_i32 = arith.constant 0 : i32
    %c0_i32_0 = arith.constant 0 : i32
    %c0_i32_1 = arith.constant 0 : i32
    return %arg0, %c0_i32, %c0_i32_0 : i32, i32, i32
  }
}

</mosaic_0001>

<bundles_post_ra>
// kernel: tpu_custom_call.1
= control target key start
LH: loop header
LB: loop body
LE: loop exit
PB: predicated region body
PF: predicated region fallthrough
CT: control target
= control target key end

     0   :  { %s4318_s0 = inlined_call_operand.hbm [shape: s32[8], index: 0, kind: input, shape index: {}]   ;;  %s4319_s1 = inlined_call_operand.hbm [shape: bf16[8,128,128], index: 1, kind: input, shape index: {}]   ;;  %s4320_s2 = inlined_call_operand.hbm [shape: bf16[8,16,128], index: 2, kind: input, shape index: {}]   ;;  %s4321_s3 = inlined_call_operand.hbm [shape: bf16[128,128], index: 3, kind: input, shape index: {}]   ;;  %s4322_s4 = inlined_call_operand.vmem [shape: f32[1,128], index: 4, kind: input, shape index: {}]   ;;  %s4323_s5 = inlined_call_operand.hbm [shape: bf16[128,128], index: 5, kind: input, shape index: {}]   ;;  %s4324_s6 = inlined_call_operand.hbm [shape: bf16[128,128], index: 6, kind: input, shape index: {}]   ;;  %s4325_s7 = inlined_call_operand.vmem [shape: f32[1,128], index: 7, kind: input, shape index: {}]   ;;  %s4326_s8 = inlined_call_operand.hbm [shape: bf16[128,256], index: 8, kind: input, shape index: {}]   ;;  %s4327_s9 = inlined_call_operand.vmem [shape: f32[1,256], index: 9, kind: input, shape index: {}]   ;;  %s4328_s10 = inlined_call_operand.hbm [shape: f32[8,16,256], index: 10, kind: output, shape index: {}]  }
   0x1   :  { %4339 = sst [smem:[#allocation25_spill]] %s4319_s1  ;;  %s3214_s15 = scalar_lea.hbm %s4318_s0, 16 }
   0x2   :  { %4340 = sst [smem:[#allocation26_spill]] %s4321_s3  ;;  %p3215_p0 = scmp.ne.s32.totalorder %s4318_s0, %s3214_s15 }
   0x3   :  { %4341 = sst [smem:[#allocation27_spill]] %s4323_s5  ;;  %p3218_p1 = scmp.lt.u32.totalorder %s3214_s15, %s4318_s0 }
   0x4   :  { %4342 = sst [smem:[#allocation28_spill]] %s4324_s6 }
   0x5   :  { %4343 = sst [smem:[#allocation29_spill]] %s4328_s10  ;;  %p3220_p2 = pnand %p3218_p1, %p3215_p0 }
   0x7   :  { %3223 = shalt.err (!%p3220_p2)  }
   0x8   :  { %s3482_s20 = smov [#allocation3]  }
   0x9   :  { %16 = dma.hbm_to_smem %s4318_s0, 16, %s3482_s20, [#allocation2] }
   0xa   :  { %3440 = dma.done.wait [#allocation2], 16 }
   0xb   :  { %3441 = vsyncadd [#allocation2], 4294967280 }
   0xc   :  { %18 = sfence }
   0xd   :  { %19 = vsyncpa [#allocation5], 0 }
   0xe   :  { %21 = vsyncpa [#allocation5 + $0x1], 0 }
   0xf   :  { %22 = vsyncpa [#allocation8], 0 }
  0x10   :  { %24 = vsyncpa [#allocation8 + $0x1], 0 }
  0x11   :  { %25 = vsyncpa [#allocation11], 0 }
  0x12   :  { %26 = vsyncpa [#allocation14], 0 }
  0x13   :  { %27 = vsyncpa [#allocation6], 0 }
  0x14   :  { %29 = vsyncpa [#allocation6 + $0x1], 0  ;;  %s3566_s23 = smov 0   ;;  %s3568_s24 = smov 0  }
  0x15   :  { %s3570_s25 = smov 0   ;;  %s3572_s26 = smov 0  }
  0x16 LB: > { %4344 = sst [smem:[#allocation23_spill]] %s3468_s23  ;;  %s3587_s0 = sadd.s32 4294967295, %s3480_s26   ;;  %s3480_s26 = sphi %s3572_s26, %s4379_s26   ;;  %s3476_s25 = sphi %s3570_s25, %s4378_s25   ;;  %s3472_s24 = sphi %s3568_s24, %s4377_s24   ;;  %s3468_s23 = sphi %s3566_s23, %s4376_s23  }
  0x17   : > { %s2302_s27 = sadd.s32 4294967294, %s3480_s26   ;;  %p55_p3 = scmp.ne.s32.totalorder %s3472_s24, %s3468_s23 }
  0x18   : > { %p4329_p4 = scmp.eq.s32.totalorder %s3587_s0, 0  ;;  %p258_p6 = scmp.eq.s32.totalorder %s2302_s27, 1 }
  0x19   : > { %p2303_p8 = scmp.ge.s32.totalorder %s3480_s26, 1  ;;  %p265_p10 = scmp.lt.s32.totalorder %s3480_s26, 3 }
  0x1a   : > { %p3596_p7 = por %p4329_p4, %p55_p3  ;;  %p3601_p9 = por %p258_p6, %p55_p3 }
  0x1b   : > { %p3606_p11 = pnand %p2303_p8, %p265_p10  ;;  %s3483_s11 = smov [#allocation9]  }
  0x1c   : > { %s4345_s28 = scalar_select %p3596_p7, 1, 0 }
  0x1d   : > { %s4346_s29 = scalar_select %p3601_p9, 1, 0 }
  0x1e   : > { %s4348_s30 = scalar_select %p3606_p11, 1, 0 }
  0x1f   : > { %4347 = sst [smem:[#allocation24_spill]] %s4346_s29  ;;  %s277_s12 = sshll.u32 %s3483_s11, 4  ;;  %s3610_s12 = int_to_ptr.vmem [resolvable:$true] %s277_s12 }
  0x20   : > { %p2874_p12 = pneg %p3606_p11  ;;  %s3484_s14 = smov [#allocation10]  }
  0x21   : > { %s293_s15 = sshll.u32 %s3484_s14, 4  ;;  %s3485_s16 = smov [#allocation12]   ;;  %s3621_s15 = int_to_ptr.vmem [resolvable:$true] %s293_s15 }
  0x22   : > { %p3617_p0 = pnand %p2874_p12, %p4329_p4  ;;  %s3623_s17 = sshll.u32 %s3485_s16, 4  ;;  %s307_s17 = int_to_ptr.vmem [resolvable:$true] %s3623_s17 }
  0x23   : > { %s4350_s3 = sld [smem:[#allocation26_spill]] }
  0x24   : > { %p3633_p2 = pneg %p3617_p0 }
  0x29   : > { %s3224_s20 = scalar_lea.hbm %s4350_s3, 1024 }
  0x2a   : > { %p3225_p1 = scmp.ne.s32.totalorder %s4350_s3, %s3224_s20  ;;  %p3231_p8 = scmp.lt.u32.totalorder %s3224_s20, %s4350_s3 }
  0x2c   : > { %p3227_p3 = pnand %p3633_p2, %p3225_p1 }
  0x2e   : > { %p3228_p6 = pneg %p3227_p3 }
  0x30   : > { %p3233_p10 = pnand %p3231_p8, %p3228_p6 }
  0x32   : > { %3236 = shalt.err (!%p3233_p10)
}
  0x33   : > { %s3237_s16 = scalar_lea.vmem %s3610_s12, 1024  ;;  %p3245_p5 = scmp.lt.s32.totalorder %s3610_s12, %s3610_s12 }
  0x34   : > { %p3238_p12 = scmp.ne.s32.totalorder %s3610_s12, %s3237_s16  ;;  %p3246_p9 = scmp.lt.s32.totalorder %s3237_s16, %s3237_s16 }
  0x36   : > { %p3240_p13 = pnand %p3238_p12, %p3633_p2  ;;  %p3247_p1 = por %p3246_p9, %p3245_p5 }
  0x38   : > { %p3241_p4 = pneg %p3240_p13 }
  0x3a   : > { %p3248_p3 = pnand %p3247_p1, %p3241_p4 }
  0x3c   : > { %3251 = shalt.err (!%p3248_p3)
}
  0x3d   : > { %s4335_s18 = smov 64   ;;  %s4337_s19 = smov 4  }
  0x3e   : > { %2877 = dma.hbm_to_vmem [thread:$0]  (!%p3617_p0), %s4350_s3, 1024, %s3610_s12, [#allocation8], %s4335_s18, %s4335_s18, %s4337_s19  }
  0x3f   : > { %s4352_s5 = sld [smem:[#allocation27_spill]] }
  0x45   : > { %s3252_s14 = scalar_lea.hbm %s4352_s5, 1024 }
  0x46   : > { %p3253_p4 = scmp.ne.s32.totalorder %s4352_s5, %s3252_s14  ;;  %p3259_p13 = scmp.lt.u32.totalorder %s3252_s14, %s4352_s5 }
  0x48   : > { %p3255_p5 = pnand %p3253_p4, %p3633_p2 }
  0x4a   : > { %p3256_p9 = pneg %p3255_p5 }
  0x4c   : > { %p3261_p6 = pnand %p3259_p13, %p3256_p9 }
  0x4e   : > { %3264 = shalt.err (!%p3261_p6)
}
  0x4f   : > { %s3265_s12 = scalar_lea.vmem %s3621_s15, 1024  ;;  %p3273_p1 = scmp.lt.s32.totalorder %s3621_s15, %s3621_s15 }
  0x50   : > { %p3266_p8 = scmp.ne.s32.totalorder %s3621_s15, %s3265_s12  ;;  %p3274_p3 = scmp.lt.s32.totalorder %s3265_s12, %s3265_s12 }
  0x52   : > { %p3268_p10 = pnand %p3266_p8, %p3633_p2  ;;  %p3275_p4 = por %p3274_p3, %p3273_p1 }
  0x54   : > { %p3269_p12 = pneg %p3268_p10 }
  0x56   : > { %p3276_p5 = pnand %p3275_p4, %p3269_p12 }
  0x58   : > { %3279 = shalt.err (!%p3276_p5)
}
  0x59   : > { %2880 = dma.hbm_to_vmem [thread:$0]  (!%p3617_p0), %s4352_s5, 1024, %s3621_s15, [#allocation11], %s4335_s18, %s4335_s18, %s4337_s19  }
  0x5a   : > { %s4353_s6 = sld [smem:[#allocation28_spill]] }
  0x60   : > { %s3280_s21 = scalar_lea.hbm %s4353_s6, 1024 }
  0x61   : > { %p3281_p9 = scmp.ne.s32.totalorder %s4353_s6, %s3280_s21  ;;  %p3287_p8 = scmp.lt.u32.totalorder %s3280_s21, %s4353_s6 }
  0x63   : > { %p3283_p13 = pnand %p3281_p9, %p3633_p2 }
  0x65   : > { %p3284_p6 = pneg %p3283_p13 }
  0x67   : > { %p3289_p10 = pnand %p3287_p8, %p3284_p6 }
  0x69   : > { %3292 = shalt.err (!%p3289_p10)
}
  0x6a   : > { %s3293_s12 = scalar_lea.vmem %s307_s17, 1024  ;;  %p3301_p4 = scmp.lt.s32.totalorder %s307_s17, %s307_s17 }
  0x6b   : > { %p3294_p12 = scmp.ne.s32.totalorder %s307_s17, %s3293_s12  ;;  %p3302_p5 = scmp.lt.s32.totalorder %s3293_s12, %s3293_s12 }
  0x6d   : > { %p3296_p1 = pnand %p3294_p12, %p3633_p2  ;;  %p3303_p7 = por %p3302_p5, %p3301_p4 }
  0x6f   : > { %p3297_p3 = pneg %p3296_p1 }
  0x71   : > { %p3304_p11 = pnand %p3303_p7, %p3297_p3 }
  0x73   : > { %3307 = shalt.err (!%p3304_p11)
}
  0x74   : > { %2883 = dma.hbm_to_vmem [thread:$0]  (!%p3617_p0), %s4353_s6, 1024, %s307_s17, [#allocation11], %s4335_s18, %s4335_s18, %s4337_s19  }
  0x75   : > { %s3488_s23 = smov [#allocation13]   ;;  %s3308_s22 = scalar_lea.hbm %s4326_s8, 2048 }
  0x76   : > { %s322_s29 = sshll.u32 %s3488_s23, 4  ;;  %p3309_p7 = scmp.ne.s32.totalorder %s4326_s8, %s3308_s22  ;;  %s323_s29 = int_to_ptr.vmem [resolvable:$true] %s322_s29 }
  0x77   : > { %p3315_p13 = scmp.lt.u32.totalorder %s3308_s22, %s4326_s8 }
  0x78   : > { %p3311_p11 = pnand %p3309_p7, %p3633_p2 }
  0x7a   : > { %p3312_p9 = pneg %p3311_p11 }
  0x7c   : > { %p3317_p6 = pnand %p3315_p13, %p3312_p9 }
  0x7e   : > { %3320 = shalt.err (!%p3317_p6)
}
  0x7f   : > { %s3321_s17 = scalar_lea.vmem %s323_s29, 2048  ;;  %p3329_p1 = scmp.lt.s32.totalorder %s323_s29, %s323_s29 }
  0x80   : > { %p3322_p8 = scmp.ne.s32.totalorder %s323_s29, %s3321_s17  ;;  %p3330_p3 = scmp.lt.s32.totalorder %s3321_s17, %s3321_s17 }
  0x82   : > { %p3324_p10 = pnand %p3322_p8, %p3633_p2  ;;  %p3331_p4 = por %p3330_p3, %p3329_p1 }
  0x84   : > { %p3325_p12 = pneg %p3324_p10 }
  0x86   : > { %p3332_p5 = pnand %p3331_p4, %p3325_p12 }
  0x88   : > { %3335 = shalt.err (!%p3332_p5)
}
  0x89   : > { %s3489_s15 = smov 128   ;;  %s3490_s27 = smov 8  }
  0x8a   : > { %2886 = dma.hbm_to_vmem [thread:$0]  (!%p3617_p0), %s4326_s8, 2048, %s323_s29, [#allocation14], %s3489_s15, %s3489_s15, %s3490_s27  }
  0x8b   : > { %s3724_s20 = sadd.s32 1, %s3480_s26   ;;  %s42_s22 = sadd.s32 1, %s3476_s25 }
  0x8c   : > { %s39_s21 = ssub.s32 %s3480_s26, %s3724_s20  ;;  %p49_p7 = scmp.ne.s32.totalorder %s3476_s25, %s3472_s24 }
  0x8d   : > { %p40_p2 = scmp.eq.s32.totalorder %s39_s21, 0  ;;  %p50_p11 = scmp.eq.s32.totalorder %s3480_s26, 0 }
  0x8e   : > { %p4354_p13 = scmp.eq.s32.totalorder %s3587_s0, 1  ;;  %p2902_p8 = scmp.lt.s32.totalorder %s3480_s26, 2 }
  0x8f   : > { %s3733_s11 = scalar_select %p40_p2, %s3476_s25, %s42_s22  }
  0x90   : > { %p51_p9 = por %p50_p11, %p49_p7  ;;  %p3737_p6 = por %p4354_p13, %p49_p7 }
  0x91   : > { %s3743_s13 = sand.u32 1, %s3476_s25   ;;  %s2415_s16 = sshll.u32 %s3480_s26, 12 }
  0x92   : > { %s2309_s29 = sshll.u32 %s3743_s13, 8  ;;  %s4356_s1 = sld [smem:[#allocation25_spill]] }
  0x93   : > { %s343_s27 = scalar_lea.vmem [#allocation4], %s2309_s29  ;;  %p3754_p0 = pnand %p2902_p8, %p51_p9 }
  0x94   : > { %s351_s10 = sshll.u32 %s343_s27, 4  ;;  %s2313_s22 = sshll.u32 %s3743_s13, 5  ;;  %s3752_s10 = int_to_ptr.vmem [resolvable:$true] %s351_s10 }
  0x95   : > { %s340_s18 = scalar_lea.sflag [#allocation5], %s3743_s13  ;;  %p3338_p12 = pneg %p3754_p0 }
  0x98   : > { %s3750_s15 = scalar_lea.hbm %s4356_s1, %s2415_s16  ;;  %s3341_s17 = scalar_lea.hbm %s4356_s1, 8192 }
  0x99   : > { %s3336_s12 = scalar_lea.hbm %s3750_s15, 4096  ;;  %p3342_p4 = scmp.lt.u32.totalorder %s3750_s15, %s4356_s1 }
  0x9a   : > { %p3337_p10 = scmp.ne.s32.totalorder %s3750_s15, %s3336_s12  ;;  %p3343_p5 = scmp.lt.u32.totalorder %s3341_s17, %s3336_s12 }
  0x9b   : > { %p3345_p7 = scmp.lt.u32.totalorder %s3336_s12, %s3750_s15 }
  0x9c   : > { %p3339_p1 = pnand %p3338_p12, %p3337_p10  ;;  %p3344_p2 = por %p3343_p5, %p3342_p4 }
  0x9e   : > { %p3340_p3 = pneg %p3339_p1  ;;  %p3346_p11 = por %p3345_p7, %p3344_p2 }
  0xa0   : > { %p3347_p9 = pnand %p3346_p11, %p3340_p3 }
  0xa2   : > { %3350 = shalt.err (!%p3347_p9)
}
  0xa3   : > { %s3351_s21 = scalar_lea.vmem %s3752_s10, 4096  ;;  %s3491_s29 = smov [#allocation4]  }
  0xa4   : > { %p3352_p13 = scmp.ne.s32.totalorder %s3752_s10, %s3351_s21  ;;  %s3356_s16 = sshll.u32 %s3491_s29, 4  ;;  %s3357_s16 = int_to_ptr.vmem [resolvable:$false] %s3356_s16 }
  0xa5   : > { %s3358_s19 = scalar_lea.vmem %s3357_s16, 8192  ;;  %p3359_p1 = scmp.lt.s32.totalorder %s3752_s10, %s3357_s16 }
  0xa6   : > { %p3354_p8 = pnand %p3352_p13, %p3338_p12  ;;  %p3360_p4 = scmp.lt.s32.totalorder %s3358_s19, %s3351_s21 }
  0xa8   : > { %p3355_p10 = pneg %p3354_p8  ;;  %p3361_p5 = por %p3360_p4, %p3359_p1 }
  0xaa   : > { %p3362_p2 = pnand %p3361_p5, %p3355_p10 }
  0xac   : > { %3365 = shalt.err (!%p3362_p2)
}
  0xad   : > { %s4358_s12 = smov 4   ;;  %s4359_s17 = smov 64  }
  0xae   : > { %2890 = dma.hbm_to_vmem [thread:$0]  (!%p3754_p0), %s3750_s15, 4096, %s3752_s10, %s340_s18, %s4359_s17, %s4359_s17, %s4358_s12  }
  0xaf   : > { %s2417_s27 = sshll.u32 %s3480_s26, 9  ;;  %s365_s19 = scalar_lea.vmem [#allocation7], %s2313_s22 }
  0xb0   : > { %s3795_s16 = scalar_lea.hbm %s4320_s2, %s2417_s27  ;;  %s373_s1 = sshll.u32 %s365_s19, 4  ;;  %s3799_s1 = int_to_ptr.vmem [resolvable:$true] %s373_s1 }
  0xb1   : > { %s4360_s3 = sand.u32 1, %s3480_s26   ;;  %s3366_s6 = scalar_lea.hbm %s3795_s16, 512 }
  0xb2   : > { %s3803_s5 = scalar_lea.sflag [#allocation8], %s4360_s3  ;;  %p3367_p3 = scmp.ne.s32.totalorder %s3795_s16, %s3366_s6 }
  0xb3   : > { %s3371_s13 = scalar_lea.hbm %s4320_s2, 1024  ;;  %p3372_p9 = scmp.lt.u32.totalorder %s3795_s16, %s4320_s2 }
  0xb4   : > { %p3369_p7 = pnand %p3367_p3, %p3338_p12  ;;  %p3373_p13 = scmp.lt.u32.totalorder %s3371_s13, %s3366_s6 }
  0xb5   : > { %p3375_p10 = scmp.lt.u32.totalorder %s3366_s6, %s3795_s16 }
  0xb6   : > { %p3370_p11 = pneg %p3369_p7  ;;  %p3374_p8 = por %p3373_p13, %p3372_p9 }
  0xb8   : > { %p3376_p1 = por %p3375_p10, %p3374_p8 }
  0xba   : > { %p3377_p4 = pnand %p3376_p1, %p3370_p11 }
  0xbc   : > { %3380 = shalt.err (!%p3377_p4)
}
  0xbd   : > { %s3381_s3 = scalar_lea.vmem %s3799_s1, 512  ;;  %s3492_s22 = smov [#allocation7]  }
  0xbe   : > { %p3382_p5 = scmp.ne.s32.totalorder %s3799_s1, %s3381_s3  ;;  %s3386_s29 = sshll.u32 %s3492_s22, 4  ;;  %s3387_s29 = int_to_ptr.vmem [resolvable:$false] %s3386_s29 }
  0xbf   : > { %s3388_s21 = scalar_lea.vmem %s3387_s29, 1024  ;;  %p3389_p7 = scmp.lt.s32.totalorder %s3799_s1, %s3387_s29 }
  0xc0   : > { %p3384_p2 = pnand %p3382_p5, %p3338_p12  ;;  %p3390_p9 = scmp.lt.s32.totalorder %s3388_s21, %s3381_s3 }
  0xc2   : > { %p3385_p3 = pneg %p3384_p2  ;;  %p3391_p13 = por %p3390_p9, %p3389_p7 }
  0xc4   : > { %p3392_p8 = pnand %p3391_p13, %p3385_p3 }
  0xc6   : > { %3395 = shalt.err (!%p3392_p8)
}
  0xc7   : > { %2893 = dma.hbm_to_vmem [thread:$0]  (!%p3754_p0), %s3795_s16, 512, %s3799_s1, %s3803_s5, %s4359_s17, %s4359_s17, %s4358_s12  }
  0xc8   : > { %p4361_p12 = scmp.ne.s32.totalorder %s4348_s30, 0 }
  0xc9   : > { %s3835_s6 = sand.u32 (!%p4361_p12), 1, %s3472_s24   ;;  %p4362_p11 = scmp.ne.s32.totalorder (!%p4361_p12), %s4345_s28, 0 }
  0xca   : > { %385 = sbr.rel (%p4361_p12) target bundleno = 1915 (0x77b), region = 56  ;;  %s2318_s19 = sshll.u32 (!%p4361_p12), %s3835_s6, 8 }
  0xcb   : > { %s388_s18 = scalar_lea.sflag (!%p4361_p12), [#allocation5], %s3835_s6  ;;  %s3839_s15 = scalar_lea.vmem (!%p4361_p12), [#allocation4], %s2318_s19 }
  0xd1   : > { %3443 = dma.done.wait (%p4362_p11), %s388_s18, 4096  }
  0xd2   : > { %3445 = vsyncadd (%p4362_p11), %s388_s18, 4294963200  ;;  %s396_s1 = sand.u32 1, %s3587_s0   ;;  %s2319_s5 = sshll.u32 %s3835_s6, 5 }
  0xd3   : > { %s397_s30 = scalar_lea.sflag [#allocation8], %s396_s1  ;;  %s3847_s23 = scalar_lea.vmem [#allocation7], %s2319_s5 }
  0xd4   : > { %3447 = dma.done.wait (%p4362_p11), %s397_s30, 512  }
  0xd5   : > { %3449 = vsyncadd (%p4362_p11), %s397_s30, 4294966784  ;;  %p4363_p0 = scmp.eq.s32.totalorder %s3587_s0, 0 }
  0xd7   : > { %3451 = dma.done.wait (%p4363_p0), [#allocation8], 1024   ;;  %p4364_p10 = pmov %p4363_p0 }
  0xd8   : > { %p4365_p1 = pmov %p4363_p0 }
  0xd9   : > { %3453 = vsyncadd (%p4364_p10), [#allocation8], 4294966272 }
  0xda   : > { %3455 = dma.done.wait (%p4365_p1), [#allocation11], 2048   ;;  %p4366_p4 = pmov %p4363_p0 }
  0xdb   : > { %p4367_p5 = pmov %p4363_p0 }
  0xdc   : > { %3457 = vsyncadd (%p4366_p4), [#allocation11], 4294965248 }
  0xdd   : > { %3459 = dma.done.wait (%p4367_p5), [#allocation14], 2048   ;;  %p4368_p2 = pmov %p4363_p0 }
  0xde   : > { %v2954_v0 = vld [vmem:[#allocation9] sm:$0xff]   ;;  %v2955_v1 = vld [vmem:[#allocation9 + $0x8] sm:$0xff]   ;;  %v2956_v2 = vld [vmem:[#allocation9 + $0x10] sm:$0xff]   ;;  %v3493_v37 = vmov 0.0   ;;  %vm3494_vm0 = vmmov 0   ;;  %s4174_s17 = sshll.u32 %s3587_s0, 2 }
  0xdf   : > { %3461 = vsyncadd (%p4368_p2), [#allocation14], 4294965248  ;;  %2556 = vmatprep.subr.bf16.mxu0 %v2954_v0  ;;  %v2957_v3 = vld [vmem:[#allocation9 + $0x18] sm:$0xff]   ;;  %v2962_v4 = vld [vmem:[%s3839_s15] sm:$0xff]   ;;  %2636 = vmatprep.subr.bf16.mxu1 %v3493_v37  ;;  %s1380_s16 = sld [smem:[#allocation3 + %s4174_s17]]  ;;  %s1385_s13 = sadd.s32 2, %s4174_s17 }
  0xe0   : > { %2557 = vmatpush3.bf16.msra.mxu0 %v2954_v0  ;;  %2572 = vmatprep.mubr.bf16.mxu0 %v2962_v4  ;;  %v2958_v5 = vld [vmem:[#allocation9 + $0x20] sm:$0xff]   ;;  %v2959_v6 = vld [vmem:[#allocation9 + $0x28] sm:$0xff]   ;;  %v2960_v7 = vld [vmem:[#allocation9 + $0x30] sm:$0xff]   ;;  %s1382_s10 = sadd.s32 1, %s4174_s17  ;;  %s1386_s27 = sld [smem:[#allocation3 + %s1385_s13]] }
  0xe1   : > { %2558 = vmatprep.subr.bf16.mxu0 %v2955_v1  ;;  %v2961_v8 = vld [vmem:[#allocation9 + $0x38] sm:$0xff]   ;;  %v2963_v9 = vld [vmem:[%s3839_s15 + $0x8] sm:$0xff]   ;;  %v2964_v10 = vld [vmem:[%s3839_s15 + $0x10] sm:$0xff]   ;;  %2652 = vmatprep.mubr.msk.bf16.mxu1 %vm3494_vm0, %v3493_v37  ;;  %s1383_s3 = sld [smem:[#allocation3 + %s1382_s10]]  ;;  %s1388_s22 = sadd.s32 3, %s4174_s17 }
  0xe2   : > { %v2965_v11 = vld [vmem:[%s3839_s15 + $0x18] sm:$0xff]   ;;  %v2966_v12 = vld [vmem:[%s3839_s15 + $0x20] sm:$0xff]   ;;  %v2967_v13 = vld [vmem:[%s3839_s15 + $0x28] sm:$0xff]   ;;  %s1389_s29 = sld [smem:[#allocation3 + %s1388_s22]]  ;;  %s2324_s1 = sshll.u32 %s3835_s6, 7 }
  0xe3   : > { %v2968_v14 = vld [vmem:[%s3839_s15 + $0x30] sm:$0xff]   ;;  %v2969_v15 = vld [vmem:[%s3839_s15 + $0x38] sm:$0xff]   ;;  %v2970_v16 = vld [vmem:[%s3839_s15 + $0x40] sm:$0xff]   ;;  %s4249_s5 = scalar_lea.vmem [#allocation15], %s2324_s1  ;;  %s2419_s30 = sshll.u32 %s3587_s0, 11 }
  0xe4   : > { %2559 = vmatpush3.bf16.msra.mxu0 %v2955_v1  ;;  %v2971_v17 = vld [vmem:[%s3839_s15 + $0x48] sm:$0xff]   ;;  %v2972_v18 = vld [vmem:[%s3839_s15 + $0x50] sm:$0xff]   ;;  %v2973_v19 = vld [vmem:[%s3839_s15 + $0x58] sm:$0xff]   ;;  %s4371_s17 = sld [smem:[#allocation29_spill]]  ;;  %s2154_s0 = scalar_lea.sflag [#allocation6], %s3835_s6 }
  0xe5   : > { %2560 = vmatprep.subr.bf16.mxu0 %v2956_v2  ;;  %v2974_v20 = vld [vmem:[%s3839_s15 + $0x60] sm:$0xff]   ;;  %v2975_v21 = vld [vmem:[%s3839_s15 + $0x68] sm:$0xff]   ;;  %v2976_v22 = vld [vmem:[%s3839_s15 + $0x70] sm:$0xff]   ;;  %s3496_s10 = smov [#allocation15]  }
  0xe6   : > { %v2977_v23 = vld [vmem:[%s3839_s15 + $0x78] sm:$0xff]   ;;  %v2978_v24 = vld [vmem:[%s3839_s15 + $0x80] sm:$0xff]   ;;  %v2979_v25 = vld [vmem:[%s3839_s15 + $0x88] sm:$0xff]  }
  0xe7   : > { %v2980_v26 = vld [vmem:[%s3839_s15 + $0x90] sm:$0xff]   ;;  %v2981_v27 = vld [vmem:[%s3839_s15 + $0x98] sm:$0xff]   ;;  %v2982_v28 = vld [vmem:[%s3839_s15 + $0xa0] sm:$0xff]  }
  0xe8   : > { %2561 = vmatpush3.bf16.msra.mxu0 %v2956_v2  ;;  %v2983_v29 = vld [vmem:[%s3839_s15 + $0xa8] sm:$0xff]   ;;  %v2984_v30 = vld [vmem:[%s3839_s15 + $0xb0] sm:$0xff]   ;;  %v2985_v31 = vld [vmem:[%s3839_s15 + $0xb8] sm:$0xff]  }
  0xe9   : > { %2562 = vmatprep.subr.bf16.mxu0 %v2957_v3  ;;  %v2986_v32 = vld [vmem:[%s3839_s15 + $0xc0] sm:$0xff]   ;;  %v2987_v33 = vld [vmem:[%s3839_s15 + $0xc8] sm:$0xff]   ;;  %v2988_v34 = vld [vmem:[%s3839_s15 + $0xd0] sm:$0xff]  }
  0xea   : > { %v2989_v35 = vld [vmem:[%s3839_s15 + $0xd8] sm:$0xff]   ;;  %v2990_v36 = vld [vmem:[%s3839_s15 + $0xe0] sm:$0xff]   ;;  %v2991_v38 = vld [vmem:[%s3839_s15 + $0xe8] sm:$0xff]  }
  0xeb   : > { %v2992_v39 = vld [vmem:[%s3839_s15 + $0xf0] sm:$0xff]   ;;  %v2993_v40 = vld [vmem:[%s3839_s15 + $0xf8] sm:$0xff]   ;;  %v3925_v4 = vld [vmem:[%s3847_s23 + $0xc] sm:$0xf] }
  0xec   : > { %2563 = vmatpush3.bf16.msra.mxu0 %v2957_v3  ;;  %v3906_v41 = vld [vmem:[%s4322_s4] ss:$0 sm:$0xff]  ;;  %v3922_v3 = vld [vmem:[%s3847_s23 + $0x8] sm:$0xf] }
  0xed   : > { %2564 = vmatprep.subr.bf16.mxu0 %v2958_v5 }
  0xf0   : > { %2565 = vmatpush3.bf16.msra.mxu0 %v2958_v5 }
  0xf1   : > { %2566 = vmatprep.subr.bf16.mxu0 %v2959_v6 }
  0xf4   : > { %2567 = vmatpush3.bf16.msra.mxu0 %v2959_v6 }
  0xf5   : > { %2568 = vmatprep.subr.bf16.mxu0 %v2960_v7 }
  0xf8   : > { %2569 = vmatpush3.bf16.msra.mxu0 %v2960_v7  ;;  %v2380_v7 = vcombine.low %v3922_v3, %v3925_v4 }
  0xf9   : > { %2570 = vmatprep.subr.bf16.mxu0 %v2961_v8 }
  0xfc   : > { %2571 = vmatpush3.bf16.msra.mxu0 %v2961_v8 }
  0xfd   : > { %2676 = vmatprep.subr.bf16.mxu0 %v3493_v37 }
  0xff   : > { %2573 = vmatmul.mubr.bf16.vlgmr.msra.gmra.mrb[0].mxu0 %v2963_v9 }
 0x100   : > { %2576 = vmatprep.mubr.bf16.mxu0 %v2964_v10 }
 0x107   : > { %2577 = vmatmul.mubr.bf16.gmra.mrb[4].mxu0 %v2965_v11 }
 0x108   : > { %2580 = vmatprep.mubr.bf16.mxu0 %v2966_v12 }
 0x10f   : > { %2581 = vmatmul.mubr.bf16.gmra.mrb[8].mxu0 %v2967_v13 }
 0x110   : > { %2584 = vmatprep.mubr.bf16.mxu0 %v2968_v14 }
 0x117   : > { %2585 = vmatmul.mubr.bf16.gmra.mrb[12].mxu0 %v2969_v15 }
 0x118   : > { %2588 = vmatprep.mubr.bf16.mxu0 %v2970_v16 }
 0x11f   : > { %2589 = vmatmul.mubr.bf16.gmra.mrb[16].mxu0 %v2971_v17 }
 0x120   : > { %2592 = vmatprep.mubr.bf16.mxu0 %v2972_v18 }
 0x127   : > { %2593 = vmatmul.mubr.bf16.gmra.mrb[20].mxu0 %v2973_v19 }
 0x128   : > { %2596 = vmatprep.mubr.bf16.mxu0 %v2974_v20 }
 0x12f   : > { %2597 = vmatmul.mubr.bf16.gmra.mrb[24].mxu0 %v2975_v21 }
 0x130   : > { %2600 = vmatprep.mubr.bf16.mxu0 %v2976_v22 }
 0x137   : > { %2601 = vmatmul.mubr.bf16.gmra.mrb[28].mxu0 %v2977_v23 }
 0x138   : > { %2604 = vmatprep.mubr.bf16.mxu0 %v2978_v24 }
 0x13f   : > { %2605 = vmatmul.mubr.bf16.gmra.mrb[32].mxu0 %v2979_v25 }
 0x140   : > { %2608 = vmatprep.mubr.bf16.mxu0 %v2980_v26 }
 0x147   : > { %2609 = vmatmul.mubr.bf16.gmra.mrb[36].mxu0 %v2981_v27 }
 0x148   : > { %2612 = vmatprep.mubr.bf16.mxu0 %v2982_v28 }
 0x14f   : > { %2613 = vmatmul.mubr.bf16.gmra.mrb[40].mxu0 %v2983_v29 }
 0x150   : > { %2616 = vmatprep.mubr.bf16.mxu0 %v2984_v30 }
 0x157   : > { %2617 = vmatmul.mubr.bf16.gmra.mrb[44].mxu0 %v2985_v31 }
 0x158   : > { %2620 = vmatprep.mubr.bf16.mxu0 %v2986_v32 }
 0x15f   : > { %2621 = vmatmul.mubr.bf16.gmra.mrb[48].mxu0 %v2987_v33 }
 0x160   : > { %2624 = vmatprep.mubr.bf16.mxu0 %v2988_v34 }
 0x167   : > { %2625 = vmatmul.mubr.bf16.gmra.mrb[52].mxu0 %v2989_v35 }
 0x168   : > { %2628 = vmatprep.mubr.bf16.mxu0 %v2990_v36 }
 0x16f   : > { %2629 = vmatmul.mubr.bf16.gmra.mrb[56].mxu0 %v2991_v38 }
 0x170   : > { %2632 = vmatprep.mubr.bf16.mxu0 %v2992_v39 }
 0x177   : > { %2633 = vmatmul.mubr.bf16.gmra.mrb[60].mxu0 %v2993_v40 }
 0x178   : > { %2692 = vmatprep.mubr.msk.bf16.mxu0 %vm3494_vm0, %v3493_v37 }
 0x1d2   : > { %v2574_v42 = vpop.f32.mrb[0].mxu0 }
 0x1d3   : > { %v831_v43 = vadd.f32 %v2574_v42, %v3906_v41  ;;  %v822_v44 = vpop.f32.mrb[1].mxu0 }
 0x1d4   : > { %v823_v45 = vadd.f32 %v3906_v41, %v822_v44  ;;  %v2575_v46 = vpop.f32.mrb[2].mxu0 }
 0x1d5   : > { %3038 = vtanh.f32 %v831_v43  ;;  %v834_v47 = vadd.f32 %v2575_v46, %v3906_v41  ;;  %v825_v48 = vpop.f32.mrb[3].mxu0 }
 0x1d6   : > { %3040 = vtanh.f32 %v823_v45  ;;  %v826_v49 = vadd.f32 %v3906_v41, %v825_v48 }
 0x1d7   : > { %3042 = vtanh.f32 %v834_v47 }
 0x1d8   : > { %3044 = vtanh.f32 %v826_v49 }
 0x1da   : > { %v2578_v50 = vpop.f32.mrb[4].mxu0 }
 0x1db   : > { %v847_v51 = vadd.f32 %v2578_v50, %v3906_v41  ;;  %v838_v52 = vpop.f32.mrb[5].mxu0 }
 0x1dc   : > { %v839_v53 = vadd.f32 %v3906_v41, %v838_v52  ;;  %v2579_v54 = vpop.f32.mrb[6].mxu0 }
 0x1dd   : > { %3046 = vtanh.f32 %v847_v51  ;;  %v850_v55 = vadd.f32 %v2579_v54, %v3906_v41  ;;  %v841_v56 = vpop.f32.mrb[7].mxu0 }
 0x1de   : > { %3048 = vtanh.f32 %v839_v53  ;;  %v842_v57 = vadd.f32 %v3906_v41, %v841_v56 }
 0x1df   : > { %v3039_v58 = vpop.eup %3038  ;;  %3050 = vtanh.f32 %v850_v55 }
 0x1e0   : > { %v3041_v59 = vpop.eup %3040  ;;  %3052 = vtanh.f32 %v842_v57 }
 0x1e1   : > { %v3043_v60 = vpop.eup %3042 }
 0x1e2   : > { %v3045_v61 = vpop.eup %3044  ;;  %v2582_v62 = vpop.f32.mrb[8].mxu0  ;;  %v3916_v63 = vpack.c.bf16 %v3043_v60, %v3039_v58 }
 0x1e3   : > { %v863_v0 = vadd.f32 %v2582_v62, %v3906_v41  ;;  %v854_v1 = vpop.f32.mrb[9].mxu0  ;;  %v3919_v2 = vpack.c.bf16 %v3045_v61, %v3041_v59 }
 0x1e4   : > { %v855_v5 = vadd.f32 %v3906_v41, %v854_v1  ;;  %v2583_v6 = vpop.f32.mrb[10].mxu0 }
 0x1e5   : > { %3054 = vtanh.f32 %v863_v0  ;;  %v866_v8 = vadd.f32 %v2583_v6, %v3906_v41  ;;  %v857_v9 = vpop.f32.mrb[11].mxu0  ;;  %2637 = vmatpush3.bf16.xpose.msra.mxu1 %v3919_v2 }
 0x1e6   : > { %3056 = vtanh.f32 %v855_v5  ;;  %v858_v10 = vadd.f32 %v3906_v41, %v857_v9  ;;  %2638 = vmatprep.subr.bf16.mxu1 %v3493_v37 }
 0x1e7   : > { %v3047_v11 = vpop.eup %3046  ;;  %3058 = vtanh.f32 %v866_v8 }
 0x1e8   : > { %v3049_v12 = vpop.eup %3048  ;;  %3060 = vtanh.f32 %v858_v10 }
 0x1e9   : > { %v3051_v13 = vpop.eup %3050 }
 0x1ea   : > { %v3053_v14 = vpop.eup %3052  ;;  %v2586_v15 = vpop.f32.mrb[12].mxu0  ;;  %v3934_v16 = vpack.c.bf16 %v3051_v13, %v3047_v11 }
 0x1eb   : > { %v879_v17 = vadd.f32 %v2586_v15, %v3906_v41  ;;  %v870_v18 = vpop.f32.mrb[13].mxu0  ;;  %v3937_v19 = vpack.c.bf16 %v3053_v14, %v3049_v12 }
 0x1ec   : > { %v871_v20 = vadd.f32 %v3906_v41, %v870_v18  ;;  %v2587_v21 = vpop.f32.mrb[14].mxu0 }
 0x1ed   : > { %3062 = vtanh.f32 %v879_v17  ;;  %v882_v22 = vadd.f32 %v2587_v21, %v3906_v41  ;;  %v873_v23 = vpop.f32.mrb[15].mxu0  ;;  %2639 = vmatpush3.bf16.xpose.msra.mxu1 %v3916_v63 }
 0x1ee   : > { %3064 = vtanh.f32 %v871_v20  ;;  %v874_v24 = vadd.f32 %v3906_v41, %v873_v23  ;;  %2640 = vmatprep.subr.bf16.mxu1 %v3493_v37 }
 0x1ef   : > { %v3055_v25 = vpop.eup %3054  ;;  %3066 = vtanh.f32 %v882_v22 }
 0x1f0   : > { %v3057_v26 = vpop.eup %3056  ;;  %3068 = vtanh.f32 %v874_v24 }
 0x1f1   : > { %v3059_v27 = vpop.eup %3058 }
 0x1f2   : > { %v3061_v28 = vpop.eup %3060  ;;  %v2590_v29 = vpop.f32.mrb[16].mxu0  ;;  %v3944_v30 = vpack.c.bf16 %v3059_v27, %v3055_v25 }
 0x1f3   : > { %v895_v31 = vadd.f32 %v2590_v29, %v3906_v41  ;;  %v886_v32 = vpop.f32.mrb[17].mxu0  ;;  %v3947_v33 = vpack.c.bf16 %v3061_v28, %v3057_v26 }
 0x1f4   : > { %v887_v34 = vadd.f32 %v3906_v41, %v886_v32  ;;  %v2591_v35 = vpop.f32.mrb[18].mxu0 }
 0x1f5   : > { %3070 = vtanh.f32 %v895_v31  ;;  %v898_v36 = vadd.f32 %v2591_v35, %v3906_v41  ;;  %v889_v38 = vpop.f32.mrb[19].mxu0  ;;  %2641 = vmatpush3.bf16.xpose.msra.mxu1 %v3937_v19 }
 0x1f6   : > { %3072 = vtanh.f32 %v887_v34  ;;  %v890_v39 = vadd.f32 %v3906_v41, %v889_v38  ;;  %2642 = vmatprep.subr.bf16.mxu1 %v3493_v37 }
 0x1f7   : > { %v3063_v40 = vpop.eup %3062  ;;  %3074 = vtanh.f32 %v898_v36 }
 0x1f8   : > { %v3065_v42 = vpop.eup %3064  ;;  %3076 = vtanh.f32 %v890_v39 }
 0x1f9   : > { %v3067_v43 = vpop.eup %3066 }
 0x1fa   : > { %v3069_v44 = vpop.eup %3068  ;;  %v2594_v45 = vpop.f32.mrb[20].mxu0  ;;  %v3954_v46 = vpack.c.bf16 %v3067_v43, %v3063_v40 }
 0x1fb   : > { %v911_v47 = vadd.f32 %v2594_v45, %v3906_v41  ;;  %v902_v48 = vpop.f32.mrb[21].mxu0  ;;  %v3957_v49 = vpack.c.bf16 %v3069_v44, %v3065_v42 }
 0x1fc   : > { %v903_v50 = vadd.f32 %v3906_v41, %v902_v48  ;;  %v2595_v51 = vpop.f32.mrb[22].mxu0  ;;  %v3995_v48 = vld [vmem:[%s3847_s23] sm:$0xf] }
 0x1fd   : > { %3078 = vtanh.f32 %v911_v47  ;;  %v914_v52 = vadd.f32 %v2595_v51, %v3906_v41  ;;  %v905_v53 = vpop.f32.mrb[23].mxu0  ;;  %2643 = vmatpush3.bf16.xpose.msra.mxu1 %v3934_v16 }
 0x1fe   : > { %3080 = vtanh.f32 %v903_v50  ;;  %v906_v54 = vadd.f32 %v3906_v41, %v905_v53  ;;  %2644 = vmatprep.subr.bf16.mxu1 %v3493_v37  ;;  %v3998_v50 = vld [vmem:[%s3847_s23 + $0x4] sm:$0xf] }
 0x1ff   : > { %v3071_v55 = vpop.eup %3070  ;;  %3082 = vtanh.f32 %v914_v52 }
 0x200   : > { %v3073_v56 = vpop.eup %3072  ;;  %3084 = vtanh.f32 %v906_v54 }
 0x201   : > { %v3075_v57 = vpop.eup %3074 }
 0x202   : > { %v3077_v58 = vpop.eup %3076  ;;  %v2598_v59 = vpop.f32.mrb[24].mxu0  ;;  %v3964_v60 = vpack.c.bf16 %v3075_v57, %v3071_v55 }
 0x203   : > { %v927_v61 = vadd.f32 %v2598_v59, %v3906_v41  ;;  %v918_v62 = vpop.f32.mrb[25].mxu0  ;;  %v3967_v0 = vpack.c.bf16 %v3077_v58, %v3073_v56  ;;  %v1181_v59 = vmul.bf16 1035287989, %v3995_v48 }
 0x204   : > { %v919_v1 = vadd.f32 %v3906_v41, %v918_v62  ;;  %v2599_v5 = vpop.f32.mrb[26].mxu0 }
 0x205   : > { %3086 = vtanh.f32 %v927_v61  ;;  %v930_v6 = vadd.f32 %v2599_v5, %v3906_v41  ;;  %v921_v8 = vpop.f32.mrb[27].mxu0  ;;  %2645 = vmatpush3.bf16.xpose.msra.mxu1 %v3947_v33  ;;  %v1182_v61 = vmul.bf16 1035287989, %v3998_v50 }
 0x206   : > { %3088 = vtanh.f32 %v919_v1  ;;  %v922_v9 = vadd.f32 %v3906_v41, %v921_v8  ;;  %2646 = vmatprep.subr.bf16.mxu1 %v3493_v37 }
 0x207   : > { %v3079_v10 = vpop.eup %3078  ;;  %3090 = vtanh.f32 %v930_v6 }
 0x208   : > { %v3081_v11 = vpop.eup %3080  ;;  %3092 = vtanh.f32 %v922_v9  ;;  %v2366_v9 = vcombine.low %v1181_v59, %v1182_v61 }
 0x209   : > { %v3083_v12 = vpop.eup %3082 }
 0x20a   : > { %v3085_v13 = vpop.eup %3084  ;;  %v2602_v14 = vpop.f32.mrb[28].mxu0  ;;  %v3974_v15 = vpack.c.bf16 %v3083_v12, %v3079_v10 }
 0x20b   : > { %v943_v17 = vadd.f32 %v2602_v14, %v3906_v41  ;;  %v934_v18 = vpop.f32.mrb[29].mxu0  ;;  %v3977_v20 = vpack.c.bf16 %v3085_v13, %v3081_v11 }
 0x20c   : > { %v935_v21 = vadd.f32 %v3906_v41, %v934_v18  ;;  %v2603_v22 = vpop.f32.mrb[30].mxu0 }
 0x20d   : > { %3094 = vtanh.f32 %v943_v17  ;;  %v946_v23 = vadd.f32 %v2603_v22, %v3906_v41  ;;  %v937_v24 = vpop.f32.mrb[31].mxu0  ;;  %2647 = vmatpush3.bf16.xpose.msra.mxu1 %v3944_v30 }
 0x20e   : > { %3096 = vtanh.f32 %v935_v21  ;;  %v938_v25 = vadd.f32 %v3906_v41, %v937_v24  ;;  %2648 = vmatprep.subr.bf16.mxu1 %v3493_v37 }
 0x20f   : > { %v3087_v26 = vpop.eup %3086  ;;  %3098 = vtanh.f32 %v946_v23 }
 0x210   : > { %v3089_v27 = vpop.eup %3088  ;;  %3100 = vtanh.f32 %v938_v25 }
 0x211   : > { %v3091_v28 = vpop.eup %3090 }
 0x212   : > { %v3093_v29 = vpop.eup %3092  ;;  %v2606_v31 = vpop.f32.mrb[32].mxu0  ;;  %v3984_v32 = vpack.c.bf16 %v3091_v28, %v3087_v26 }
 0x213   : > { %v959_v34 = vadd.f32 %v2606_v31, %v3906_v41  ;;  %v950_v35 = vpop.f32.mrb[33].mxu0  ;;  %v3987_v36 = vpack.c.bf16 %v3093_v29, %v3089_v27 }
 0x214   : > { %v951_v38 = vadd.f32 %v3906_v41, %v950_v35  ;;  %v2607_v39 = vpop.f32.mrb[34].mxu0 }
 0x215   : > { %3102 = vtanh.f32 %v959_v34  ;;  %v962_v40 = vadd.f32 %v2607_v39, %v3906_v41  ;;  %v953_v42 = vpop.f32.mrb[35].mxu0  ;;  %2649 = vmatpush3.bf16.xpose.msra.mxu1 %v3957_v49 }
 0x216   : > { %3104 = vtanh.f32 %v951_v38  ;;  %v954_v43 = vadd.f32 %v3906_v41, %v953_v42  ;;  %2650 = vmatprep.subr.bf16.mxu1 %v3493_v37 }
 0x217   : > { %v3095_v44 = vpop.eup %3094  ;;  %3106 = vtanh.f32 %v962_v40 }
 0x218   : > { %v3097_v45 = vpop.eup %3096  ;;  %3108 = vtanh.f32 %v954_v43 }
 0x219   : > { %v3099_v47 = vpop.eup %3098 }
 0x21a   : > { %v3101_v51 = vpop.eup %3100  ;;  %v2610_v52 = vpop.f32.mrb[36].mxu0  ;;  %v4000_v53 = vpack.c.bf16 %v3099_v47, %v3095_v44 }
 0x21b   : > { %v975_v54 = vadd.f32 %v2610_v52, %v3906_v41  ;;  %v966_v55 = vpop.f32.mrb[37].mxu0  ;;  %v4003_v56 = vpack.c.bf16 %v3101_v51, %v3097_v45 }
 0x21c   : > { %v967_v57 = vadd.f32 %v3906_v41, %v966_v55  ;;  %v2611_v58 = vpop.f32.mrb[38].mxu0 }
 0x21d   : > { %2651 = vmatpush3.bf16.xpose.msra.mxu1 %v3954_v46  ;;  %3110 = vtanh.f32 %v975_v54  ;;  %v978_v62 = vadd.f32 %v2611_v58, %v3906_v41  ;;  %v969_v1 = vpop.f32.mrb[39].mxu0 }
 0x21e   : > { %3112 = vtanh.f32 %v967_v57  ;;  %2656 = vmatprep.subr.bf16.mxu1 %v3493_v37  ;;  %v970_v5 = vadd.f32 %v3906_v41, %v969_v1 }
 0x21f   : > { %v3103_v6 = vpop.eup %3102  ;;  %3114 = vtanh.f32 %v978_v62 }
 0x220   : > { %v3105_v8 = vpop.eup %3104  ;;  %3116 = vtanh.f32 %v970_v5 }
 0x221   : > { %v3107_v10 = vpop.eup %3106 }
 0x222   : > { %v3109_v11 = vpop.eup %3108  ;;  %v4012_v12 = vpack.c.bf16 %v3107_v10, %v3103_v6  ;;  %v2614_v13 = vpop.f32.mrb[40].mxu0 }
 0x223   : > { %v4014_v14 = vpack.c.bf16 %v3109_v11, %v3105_v8  ;;  %v991_v17 = vadd.f32 %v2614_v13, %v3906_v41  ;;  %v982_v18 = vpop.f32.mrb[41].mxu0 }
 0x224   : > { %2653 = vmatmul.mubr.bf16.vlgmr.msra.gmra.mrb[0].mxu1 %v2366_v9  ;;  %v983_v21 = vadd.f32 %v3906_v41, %v982_v18  ;;  %v2615_v22 = vpop.f32.mrb[42].mxu0 }
 0x225   : > { %2657 = vmatpush3.bf16.xpose.msra.mxu1 %v3967_v0  ;;  %2677 = vmatpush3.bf16.xpose.msra.mxu0 %v4014_v14  ;;  %3118 = vtanh.f32 %v991_v17  ;;  %v994_v23 = vadd.f32 %v2615_v22, %v3906_v41  ;;  %v985_v24 = vpop.f32.mrb[43].mxu0 }
 0x226   : > { %2658 = vmatprep.subr.bf16.mxu1 %v3493_v37  ;;  %2678 = vmatprep.subr.bf16.mxu0 %v3493_v37  ;;  %3120 = vtanh.f32 %v983_v21  ;;  %v986_v25 = vadd.f32 %v3906_v41, %v985_v24 }
 0x227   : > { %v3111_v26 = vpop.eup %3110  ;;  %3122 = vtanh.f32 %v994_v23  ;;  %2672 = vmatprep.mubr.msk.bf16.mxu1 %vm3494_vm0, %v3493_v37 }
 0x228   : > { %v3113_v27 = vpop.eup %3112  ;;  %3124 = vtanh.f32 %v986_v25 }
 0x229   : > { %v3115_v28 = vpop.eup %3114 }
 0x22a   : > { %v3117_v29 = vpop.eup %3116  ;;  %v4026_v31 = vpack.c.bf16 %v3115_v28, %v3111_v26  ;;  %v2618_v34 = vpop.f32.mrb[44].mxu0 }
 0x22b   : > { %v4028_v35 = vpack.c.bf16 %v3117_v29, %v3113_v27  ;;  %v1007_v38 = vadd.f32 %v2618_v34, %v3906_v41  ;;  %v998_v39 = vpop.f32.mrb[45].mxu0 }
 0x22c   : > { %v999_v40 = vadd.f32 %v3906_v41, %v998_v39  ;;  %v2619_v42 = vpop.f32.mrb[46].mxu0 }
 0x22d   : > { %2659 = vmatpush3.bf16.xpose.msra.mxu1 %v3964_v60  ;;  %2679 = vmatpush3.bf16.xpose.msra.mxu0 %v4012_v12  ;;  %3126 = vtanh.f32 %v1007_v38  ;;  %v1010_v43 = vadd.f32 %v2619_v42, %v3906_v41  ;;  %v1001_v44 = vpop.f32.mrb[47].mxu0 }
 0x22e   : > { %2660 = vmatprep.subr.bf16.mxu1 %v3493_v37  ;;  %2680 = vmatprep.subr.bf16.mxu0 %v3493_v37  ;;  %3128 = vtanh.f32 %v999_v40  ;;  %v1002_v45 = vadd.f32 %v3906_v41, %v1001_v44 }
 0x22f   : > { %v3119_v47 = vpop.eup %3118  ;;  %3130 = vtanh.f32 %v1010_v43 }
 0x230   : > { %v3121_v51 = vpop.eup %3120  ;;  %3132 = vtanh.f32 %v1002_v45 }
 0x231   : > { %v3123_v52 = vpop.eup %3122 }
 0x232   : > { %v3125_v54 = vpop.eup %3124  ;;  %v4038_v55 = vpack.c.bf16 %v3123_v52, %v3119_v47  ;;  %v2622_v57 = vpop.f32.mrb[48].mxu0 }
 0x233   : > { %v4040_v58 = vpack.c.bf16 %v3125_v54, %v3121_v51  ;;  %v1023_v59 = vadd.f32 %v2622_v57, %v3906_v41  ;;  %v1014_v61 = vpop.f32.mrb[49].mxu0 }
 0x234   : > { %v1015_v62 = vadd.f32 %v3906_v41, %v1014_v61  ;;  %v2623_v1 = vpop.f32.mrb[50].mxu0 }
 0x235   : > { %2661 = vmatpush3.bf16.xpose.msra.mxu1 %v3977_v20  ;;  %2681 = vmatpush3.bf16.xpose.msra.mxu0 %v4028_v35  ;;  %3134 = vtanh.f32 %v1023_v59  ;;  %v1026_v5 = vadd.f32 %v2623_v1, %v3906_v41  ;;  %v1017_v6 = vpop.f32.mrb[51].mxu0 }
 0x236   : > { %2662 = vmatprep.subr.bf16.mxu1 %v3493_v37  ;;  %2682 = vmatprep.subr.bf16.mxu0 %v3493_v37  ;;  %3136 = vtanh.f32 %v1015_v62  ;;  %v1018_v8 = vadd.f32 %v3906_v41, %v1017_v6 }
 0x237   : > { %v3127_v9 = vpop.eup %3126  ;;  %3138 = vtanh.f32 %v1026_v5 }
 0x238   : > { %v3129_v10 = vpop.eup %3128  ;;  %3140 = vtanh.f32 %v1018_v8 }
 0x239   : > { %v3131_v11 = vpop.eup %3130 }
 0x23a   : > { %v3133_v13 = vpop.eup %3132  ;;  %v4050_v17 = vpack.c.bf16 %v3131_v11, %v3127_v9  ;;  %v2626_v18 = vpop.f32.mrb[52].mxu0 }
 0x23b   : > { %v4052_v21 = vpack.c.bf16 %v3133_v13, %v3129_v10  ;;  %v1039_v22 = vadd.f32 %v2626_v18, %v3906_v41  ;;  %v1030_v23 = vpop.f32.mrb[53].mxu0 }
 0x23c   : > { %v1031_v24 = vadd.f32 %v3906_v41, %v1030_v23  ;;  %v2627_v25 = vpop.f32.mrb[54].mxu0 }
 0x23d   : > { %2663 = vmatpush3.bf16.xpose.msra.mxu1 %v3974_v15  ;;  %2683 = vmatpush3.bf16.xpose.msra.mxu0 %v4026_v31  ;;  %3142 = vtanh.f32 %v1039_v22  ;;  %v1042_v26 = vadd.f32 %v2627_v25, %v3906_v41  ;;  %v1033_v27 = vpop.f32.mrb[55].mxu0 }
 0x23e   : > { %2664 = vmatprep.subr.bf16.mxu1 %v3493_v37  ;;  %2684 = vmatprep.subr.bf16.mxu0 %v3493_v37  ;;  %3144 = vtanh.f32 %v1031_v24  ;;  %v1034_v28 = vadd.f32 %v3906_v41, %v1033_v27 }
 0x23f   : > { %v3135_v29 = vpop.eup %3134  ;;  %3146 = vtanh.f32 %v1042_v26 }
 0x240   : > { %v3137_v34 = vpop.eup %3136  ;;  %3148 = vtanh.f32 %v1034_v28 }
 0x241   : > { %v3139_v38 = vpop.eup %3138 }
 0x242   : > { %v3141_v39 = vpop.eup %3140  ;;  %v4062_v40 = vpack.c.bf16 %v3139_v38, %v3135_v29  ;;  %v2630_v42 = vpop.f32.mrb[56].mxu0 }
 0x243   : > { %v4064_v43 = vpack.c.bf16 %v3141_v39, %v3137_v34  ;;  %v1055_v44 = vadd.f32 %v2630_v42, %v3906_v41  ;;  %v1046_v45 = vpop.f32.mrb[57].mxu0  ;;  %v4095_v39 = vld [vmem:[%s3847_s23 + $0x10] sm:$0xf]  ;;  %v4098_v42 = vld [vmem:[%s3847_s23 + $0x14] sm:$0xf] }
 0x244   : > { %v1047_v47 = vadd.f32 %v3906_v41, %v1046_v45  ;;  %v2631_v51 = vpop.f32.mrb[58].mxu0 }
 0x245   : > { %2665 = vmatpush3.bf16.xpose.msra.mxu1 %v3987_v36  ;;  %2685 = vmatpush3.bf16.xpose.msra.mxu0 %v4040_v58  ;;  %3150 = vtanh.f32 %v1055_v44  ;;  %v1058_v52 = vadd.f32 %v2631_v51, %v3906_v41  ;;  %v1049_v54 = vpop.f32.mrb[59].mxu0 }
 0x246   : > { %2666 = vmatprep.subr.bf16.mxu1 %v3493_v37  ;;  %2686 = vmatprep.subr.bf16.mxu0 %v3493_v37  ;;  %3152 = vtanh.f32 %v1047_v47  ;;  %v1050_v57 = vadd.f32 %v3906_v41, %v1049_v54  ;;  %v1183_v47 = vmul.bf16 1035287989, %v3922_v3  ;;  %v1185_v54 = vmul.bf16 1035287989, %v4095_v39  ;;  %v3037_v3 = vld [vmem:[#allocation13 + $0x74] ss:$8 sps:$4 sm:$0xff]  }
 0x247   : > { %v3143_v59 = vpop.eup %3142  ;;  %3154 = vtanh.f32 %v1058_v52  ;;  %v1184_v52 = vmul.bf16 1035287989, %v3925_v4  ;;  %v3495_v4 = vmov 0  }
 0x248   : > { %v3145_v61 = vpop.eup %3144  ;;  %3156 = vtanh.f32 %v1050_v57  ;;  %v1186_v57 = vmul.bf16 1035287989, %v4098_v42 }
 0x249   : > { %v3147_v62 = vpop.eup %3146 }
 0x24a   : > { %v3149_v1 = vpop.eup %3148  ;;  %v4074_v5 = vpack.c.bf16 %v3147_v62, %v3143_v59  ;;  %v2634_v6 = vpop.f32.mrb[60].mxu0  ;;  %v2367_v59 = vcombine.low %v1183_v47, %v1184_v52 }
 0x24b   : > { %v4076_v8 = vpack.c.bf16 %v3149_v1, %v3145_v61  ;;  %v1071_v9 = vadd.f32 %v2634_v6, %v3906_v41  ;;  %v1062_v10 = vpop.f32.mrb[61].mxu0  ;;  %v2368_v61 = vcombine.low %v1185_v54, %v1186_v57 }
 0x24c   : > { %v1063_v11 = vadd.f32 %v3906_v41, %v1062_v10  ;;  %v2635_v13 = vpop.f32.mrb[62].mxu0 }
 0x24d   : > { %2667 = vmatpush3.bf16.xpose.msra.mxu1 %v3984_v32  ;;  %2687 = vmatpush3.bf16.xpose.msra.mxu0 %v4038_v55  ;;  %3158 = vtanh.f32 %v1071_v9  ;;  %v1074_v18 = vadd.f32 %v2635_v13, %v3906_v41  ;;  %v1065_v22 = vpop.f32.mrb[63].mxu0 }
 0x24e   : > { %2668 = vmatprep.subr.bf16.mxu1 %v3493_v37  ;;  %2688 = vmatprep.subr.bf16.mxu0 %v3493_v37  ;;  %3160 = vtanh.f32 %v1063_v11  ;;  %v1066_v23 = vadd.f32 %v3906_v41, %v1065_v22 }
 0x24f   : > { %v3151_v24 = vpop.eup %3150  ;;  %3162 = vtanh.f32 %v1074_v18 }
 0x250   : > { %v3153_v25 = vpop.eup %3152  ;;  %3164 = vtanh.f32 %v1066_v23 }
 0x251   : > { %v3155_v26 = vpop.eup %3154 }
 0x252   : > { %v3157_v27 = vpop.eup %3156  ;;  %v4086_v28 = vpack.c.bf16 %v3155_v26, %v3151_v24 }
 0x253   : > { %v4088_v29 = vpack.c.bf16 %v3157_v27, %v3153_v25  ;;  %v1390_v27 = vstv %s1389_s29 }
 0x255   : > { %2669 = vmatpush3.bf16.xpose.msra.mxu1 %v4003_v56  ;;  %2689 = vmatpush3.bf16.xpose.msra.mxu0 %v4052_v21 }
 0x256   : > { %2670 = vmatprep.subr.bf16.mxu1 %v3493_v37  ;;  %2690 = vmatprep.subr.bf16.mxu0 %v3493_v37 }
 0x257   : > { %v3159_v41 = vpop.eup %3158 }
 0x258   : > { %v3161_v34 = vpop.eup %3160 }
 0x259   : > { %v3163_v38 = vpop.eup %3162 }
 0x25a   : > { %v3165_v44 = vpop.eup %3164  ;;  %v4100_v45 = vpack.c.bf16 %v3163_v38, %v3159_v41 }
 0x25b   : > { %v4103_v51 = vpack.c.bf16 %v3165_v44, %v3161_v34 }
 0x25d   : > { %2671 = vmatpush3.bf16.xpose.msra.mxu1 %v4000_v53  ;;  %2691 = vmatpush3.bf16.xpose.msra.mxu0 %v4050_v17 }
 0x25e   : > { %2696 = vmatprep.subr.bf16.mxu1 %v3493_v37  ;;  %2716 = vmatprep.subr.bf16.mxu0 %v3493_v37 }
 0x264   : > { %2673 = vmatmul.mubr.bf16.vlgmr.msra.gmra.mrb[4].mxu1 %v2367_v59  ;;  %2693 = vmatmul.mubr.bf16.vlgmr.msra.gmra.mrb[64].mxu0 %v2368_v61 }
 0x265   : > { %2697 = vmatpush3.bf16.xpose.msra.mxu1 %v4064_v43  ;;  %2717 = vmatpush3.bf16.msra.mxu0 %v3919_v2  ;;  %v4150_v2 = vld [vmem:[%s3847_s23 + $0x1c] sm:$0xf] }
 0x266   : > { %2718 = vmatprep.subr.bf16.mxu0 %v3493_v37  ;;  %2698 = vmatprep.subr.bf16.mxu1 %v3493_v37 }
 0x267   : > { %2712 = vmatprep.mubr.msk.bf16.mxu1 %vm3494_vm0, %v3493_v37  ;;  %2732 = vmatprep.mubr.msk.bf16.mxu0 %vm3494_vm0, %v3493_v37 }
 0x269   : > { %2719 = vmatpush3.bf16.msra.mxu0 %v3916_v63  ;;  %v4147_v63 = vld [vmem:[%s3847_s23 + $0x18] sm:$0xf]  ;;  %s2168_s23 = sshll.u32 %s4249_s5, 4  ;;  %s4271_s23 = int_to_ptr.vmem [resolvable:$true] %s2168_s23 }
 0x26a   : > { %2720 = vmatprep.subr.bf16.mxu0 %v3493_v37  ;;  %s3396_s13 = scalar_lea.vmem %s4271_s23, 2048 }
 0x26b   : > { %p3397_p3 = scmp.ne.s32.totalorder %s4271_s23, %s3396_s13 }
 0x26d   : > { %2699 = vmatpush3.bf16.xpose.msra.mxu1 %v4062_v40  ;;  %2721 = vmatpush3.bf16.msra.mxu0 %v3937_v19  ;;  %v1188_v19 = vmul.bf16 1035287989, %v4150_v2  ;;  %p3398_p7 = pnand %p3397_p3, %p3737_p6 }
 0x26e   : > { %2722 = vmatprep.subr.bf16.mxu0 %v3493_v37  ;;  %2700 = vmatprep.subr.bf16.mxu1 %v3493_v37 }
 0x26f   : > { %p3399_p9 = pneg %p3398_p7 }
 0x271   : > { %2723 = vmatpush3.bf16.msra.mxu0 %v3934_v16  ;;  %v1187_v16 = vmul.bf16 1035287989, %v4147_v63 }
 0x272   : > { %2724 = vmatprep.subr.bf16.mxu0 %v3493_v37 }
 0x275   : > { %2701 = vmatpush3.bf16.xpose.msra.mxu1 %v4076_v8  ;;  %2725 = vmatpush3.bf16.msra.mxu0 %v3947_v33  ;;  %v1377_v33 = vlaneseq }
 0x276   : > { %2726 = vmatprep.subr.bf16.mxu0 %v3493_v37  ;;  %2702 = vmatprep.subr.bf16.mxu1 %v3493_v37 }
 0x279   : > { %2727 = vmatpush3.bf16.msra.mxu0 %v3944_v30  ;;  %v2369_v30 = vcombine.low %v1187_v16, %v1188_v19 }
 0x27a   : > { %2728 = vmatprep.subr.bf16.mxu0 %v3493_v37 }
 0x27d   : > { %2703 = vmatpush3.bf16.xpose.msra.mxu1 %v4074_v5  ;;  %2729 = vmatpush3.bf16.msra.mxu0 %v3957_v49  ;;  %v1381_v49 = vstv %s1380_s16  ;;  %s4269_s16 = scalar_lea.hbm %s4371_s17, %s2419_s30 }
 0x27e   : > { %2730 = vmatprep.subr.bf16.mxu0 %v3493_v37  ;;  %2704 = vmatprep.subr.bf16.mxu1 %v3493_v37 }
 0x281   : > { %2731 = vmatpush3.bf16.msra.mxu0 %v3954_v46  ;;  %v1378_v46 = vand.u32 127, %v1377_v33 }
 0x282   : > { %2736 = vmatprep.subr.bf16.mxu0 %v3493_v37 }
 0x283   : > { %vm1391_vm1 = vcmp.lt.s32.totalorder %v1378_v46, %v1381_v49  ;;  %vm1394_vm4 = vcmp.lt.s32.totalorder %v1378_v46, %v1390_v27 }
 0x285   : > { %2705 = vmatpush3.bf16.xpose.msra.mxu1 %v4088_v29 }
 0x286   : > { %2706 = vmatprep.subr.bf16.mxu1 %v3493_v37 }
 0x28d   : > { %2707 = vmatpush3.bf16.xpose.msra.mxu1 %v4086_v28 }
 0x28e   : > { %2708 = vmatprep.subr.bf16.mxu1 %v3493_v37 }
 0x295   : > { %2709 = vmatpush3.bf16.xpose.msra.mxu1 %v4103_v51 }
 0x296   : > { %2710 = vmatprep.subr.bf16.mxu1 %v3493_v37 }
 0x29d   : > { %2711 = vmatpush3.bf16.xpose.msra.mxu1 %v4100_v45 }
 0x29e   : > { %2756 = vmatprep.subr.bf16.mxu1 %v3493_v37 }
 0x2a4   : > { %2713 = vmatmul.mubr.bf16.vlgmr.msra.gmra.mrb[8].mxu1 %v2369_v30 }
 0x2a5   : > { %2757 = vmatpush3.bf16.msra.mxu1 %v4014_v14  ;;  %2772 = vmatprep.mubr.msk.bf16.mxu1 %vm3494_vm0, %v3493_v37 }
 0x2a6   : > { %2758 = vmatprep.subr.bf16.mxu1 %v3493_v37 }
 0x2a9   : > { %2759 = vmatpush3.bf16.msra.mxu1 %v4012_v12 }
 0x2aa   : > { %2760 = vmatprep.subr.bf16.mxu1 %v3493_v37 }
 0x2ad   : > { %2761 = vmatpush3.bf16.msra.mxu1 %v4028_v35 }
 0x2ae   : > { %2762 = vmatprep.subr.bf16.mxu1 %v3493_v37 }
 0x2b1   : > { %2763 = vmatpush3.bf16.msra.mxu1 %v4026_v31 }
 0x2b2   : > { %2764 = vmatprep.subr.bf16.mxu1 %v3493_v37 }
 0x2b5   : > { %2765 = vmatpush3.bf16.msra.mxu1 %v4040_v58 }
 0x2b6   : > { %2766 = vmatprep.subr.bf16.mxu1 %v3493_v37 }
 0x2b9   : > { %2767 = vmatpush3.bf16.msra.mxu1 %v4038_v55 }
 0x2ba   : > { %2768 = vmatprep.subr.bf16.mxu1 %v3493_v37 }
 0x2bd   : > { %2769 = vmatpush3.bf16.msra.mxu1 %v4052_v21  ;;  %v1384_v21 = vstv %s1383_s3 }
 0x2be   : > { %2770 = vmatprep.subr.bf16.mxu1 %v3493_v37  ;;  %vm1392_vm3 = vcmp.lt.s32.totalorder %v1378_v46, %v1384_v21 }
 0x2c1   : > { %2771 = vmatpush3.bf16.msra.mxu1 %v4050_v17  ;;  %v1387_v17 = vstv %s1386_s27  ;;  %s3400_s27 = sshll.u32 %s3496_s10, 4  ;;  %s3401_s27 = int_to_ptr.vmem [resolvable:$false] %s3400_s27 }
 0x2c2   : > { %vm4180_vm2 = vcmp.lt.s32.totalorder %v1378_v46, %v1387_v17  ;;  %s3402_s3 = scalar_lea.vmem %s3401_s27, 4096  ;;  %p3403_p13 = scmp.lt.s32.totalorder %s4271_s23, %s3401_s27 }
 0x2c3   : > { %p3404_p8 = scmp.lt.s32.totalorder %s3402_s3, %s3396_s13 }
 0x2c5   : > { %p3405_p12 = por %p3404_p8, %p3403_p13 }
 0x2c7   : > { %p3406_p11 = pnand %p3405_p12, %p3399_p9 }
 0x2f7   : > { %v1229_v12 = vpop.f32.mrb[0].mxu1 }
 0x2f8   : > { %v1395_v14 = vsel %vm1391_vm1, %v1229_v12, -1e+30  ;;  %v2654_v31 = vpop.f32.mrb[1].mxu1 }
 0x2f9   : > { %1403 = vmax.xlane.f32.xlu0 %v1395_v14  ;;  %v1232_v35 = vpop.f32.mrb[2].mxu1 }
 0x2fa   : > { %v2655_v55 = vpop.f32.mrb[3].mxu1  ;;  %v1396_v58 = vsel %vm1391_vm1, %v1232_v35, -1e+30 }
 0x2fd   : > { %1405 = vmax.xlane.f32.xlu0 %v1396_v58 }
 0x337   : > { %v1276_v1 = vpop.f32.mrb[4].mxu1  ;;  %v1323_v6 = vpop.f32.mrb[64].mxu0 }
 0x338   : > { %v1399_v9 = vsel %vm4180_vm2, %v1323_v6, -1e+30  ;;  %v1397_v10 = vsel %vm1392_vm3, %v1276_v1, -1e+30  ;;  %v2674_v11 = vpop.f32.mrb[5].mxu1  ;;  %v2694_v13 = vpop.f32.mrb[65].mxu0 }
 0x339   : > { %1411 = vmax.xlane.f32.xlu0 %v1399_v9  ;;  %1407 = vmax.xlane.f32.xlu1 %v1397_v10  ;;  %v1279_v18 = vpop.f32.mrb[6].mxu1  ;;  %v1326_v22 = vpop.f32.mrb[66].mxu0 }
 0x33a   : > { %v2675_v23 = vpop.f32.mrb[7].mxu1  ;;  %v2695_v24 = vpop.f32.mrb[67].mxu0  ;;  %v1398_v25 = vsel %vm1392_vm3, %v1279_v18, -1e+30  ;;  %v1400_v26 = vsel %vm4180_vm2, %v1326_v22, -1e+30 }
 0x33d   : > { %1409 = vmax.xlane.f32.xlu1 %v1398_v25 }
 0x341   : > { %1413 = vmax.xlane.f32.xlu1 %v1400_v26 }
 0x377   : > { %v1370_v41 = vpop.f32.mrb[8].mxu1 }
 0x378   : > { %v2714_v34 = vpop.f32.mrb[9].mxu1  ;;  %v1401_v38 = vsel %vm1394_vm4, %v1370_v41, -1e+30 }
 0x379   : > { %1415 = vmax.xlane.f32.xlu0 %v1401_v38  ;;  %v1373_v44 = vpop.f32.mrb[10].mxu1 }
 0x37a   : > { %v1402_v47 = vsel %vm1394_vm4, %v1373_v44, -1e+30  ;;  %v2715_v52 = vpop.f32.mrb[11].mxu1 }
 0x37b   : > { %1417 = vmax.xlane.f32.xlu1 %v1402_v47 }
 0x386   : > { %v1404_v54 = vpop.xlane.xlu0 %1403 }
 0x387   : > { %v1419_v57 = vsub.f32 %v1395_v14, %v1404_v54 }
 0x389   : > { %v1427_v59 = vmul.f32 1.442695, %v1419_v57 }
 0x38a   : > { %v1406_v61 = vpop.xlane.xlu0 %1405 }
 0x38b   : > { %3166 = vpow2.f32 %v1427_v59  ;;  %v1420_v16 = vsub.f32 %v1396_v58, %v1406_v61 }
 0x38d   : > { %v1429_v19 = vmul.f32 1.442695, %v1420_v16 }
 0x38f   : > { %3168 = vpow2.f32 %v1429_v19 }
 0x395   : > { %v3167_v30 = vpop.eup %3166 }
 0x396   : > { %1443 = vadd.xlane.f32.xlu0 %v3167_v30 }
 0x399   : > { %v3169_v49 = vpop.eup %3168 }
 0x39a   : > { %1445 = vadd.xlane.f32.xlu1 %v3169_v49 }
 0x3c6   : > { %v1412_v46 = vpop.xlane.xlu0 %1411  ;;  %v1408_v12 = vpop.xlane.xlu1 %1407 }
 0x3c7   : > { %v1421_v31 = vsub.f32 %v1397_v10, %v1408_v12  ;;  %v1423_v35 = vsub.f32 %v1399_v9, %v1412_v46 }
 0x3c9   : > { %v1431_v55 = vmul.f32 1.442695, %v1421_v31  ;;  %v1435_v62 = vmul.f32 1.442695, %v1423_v35 }
 0x3ca   : > { %v1410_v17 = vpop.xlane.xlu1 %1409 }
 0x3cb   : > { %v1422_v21 = vsub.f32 %v1398_v25, %v1410_v17  ;;  %3170 = vpow2.f32 %v1431_v55  ;;  %v3002_v17 = vld [vmem:[#allocation12 + $0x38] sm:$0xff]  }
 0x3cd   : > { %v1433_v14 = vmul.f32 1.442695, %v1422_v21  ;;  %v3003_v21 = vld [vmem:[#allocation10] sm:$0xff]  }
 0x3ce   : > { %v1414_v1 = vpop.xlane.xlu1 %1413 }
 0x3cf   : > { %3172 = vpow2.f32 %v1433_v14  ;;  %v1424_v6 = vsub.f32 %v1400_v26, %v1414_v1 }
 0x3d0   : > { %3174 = vpow2.f32 %v1435_v62 }
 0x3d1   : > { %v1437_v58 = vmul.f32 1.442695, %v1424_v6 }
 0x3d3   : > { %3176 = vpow2.f32 %v1437_v58 }
 0x3d5   : > { %v3171_v11 = vpop.eup %3170 }
 0x3d6   : > { %1447 = vadd.xlane.f32.xlu0 %v3171_v11 }
 0x3d9   : > { %v3173_v13 = vpop.eup %3172 }
 0x3da   : > { %v3175_v18 = vpop.eup %3174  ;;  %1449 = vadd.xlane.f32.xlu1 %v3173_v13 }
 0x3db   : > { %1451 = vadd.xlane.f32.xlu0 %v3175_v18 }
 0x3dd   : > { %v3177_v10 = vpop.eup %3176 }
 0x3de   : > { %1453 = vadd.xlane.f32.xlu1 %v3177_v10 }
 0x406   : > { %v1416_v9 = vpop.xlane.xlu0 %1415 }
 0x407   : > { %v1425_v22 = vsub.f32 %v1401_v38, %v1416_v9  ;;  %v3022_v9 = vld [vmem:[#allocation13 + $0x24] ss:$8 sps:$4 sm:$0xff]  }
 0x408   : > { %v1418_v23 = vpop.xlane.xlu1 %1417 }
 0x409   : > { %v1439_v24 = vmul.f32 1.442695, %v1425_v22  ;;  %v1426_v25 = vsub.f32 %v1402_v47, %v1418_v23  ;;  %v3020_v22 = vld [vmem:[#allocation13 + $0x20] ss:$8 sps:$4 sm:$0xff]   ;;  %v3025_v23 = vld [vmem:[#allocation13 + $0x34] ss:$8 sps:$4 sm:$0xff]  }
 0x40b   : > { %3178 = vpow2.f32 %v1439_v24  ;;  %v1441_v27 = vmul.f32 1.442695, %v1426_v25  ;;  %v3023_v24 = vld [vmem:[#allocation13 + $0x30] ss:$8 sps:$4 sm:$0xff]  }
 0x40d   : > { %3180 = vpow2.f32 %v1441_v27 }
 0x415   : > { %v4189_v26 = vpop.eup %3178 }
 0x416   : > { %1455 = vadd.xlane.f32.xlu0 %v4189_v26 }
 0x417   : > { %v4192_v41 = vpop.eup %3180 }
 0x418   : > { %1457 = vadd.xlane.f32.xlu1 %v4192_v41 }
 0x423   : > { %v1444_v34 = vpop.xlane.xlu0 %1443 }
 0x424   : > { %3182 = vrcp.f32 %v1444_v34 }
 0x427   : > { %v1446_v44 = vpop.xlane.xlu1 %1445 }
 0x428   : > { %3184 = vrcp.f32 %v1446_v44  ;;  %v3004_v44 = vld [vmem:[#allocation10 + $0x8] sm:$0xff]  }
 0x42e   : > { %v3183_v52 = vpop.eup %3182 }
 0x42f   : > { %v1467_v54 = vmul.f32 %v3183_v52, %v3167_v30 }
 0x432   : > { %v3185_v38 = vpop.eup %3184 }
 0x433   : > { %v1468_v57 = vmul.f32 %v3185_v38, %v3169_v49 }
 0x435   : > { %v1475_v47 = vpack.c.bf16 %v1468_v57, %v1467_v54 }
 0x437   : > { %2733 = vmatmul.mubr.bf16.vlgmr.msra.gmra.mrb[68].mxu0 %v1475_v47 }
 0x438   : > { %2737 = vmatpush3.bf16.msra.mxu0 %v3967_v0  ;;  %2752 = vmatprep.mubr.msk.bf16.mxu0 %vm3494_vm0, %v3493_v37 }
 0x439   : > { %2738 = vmatprep.subr.bf16.mxu0 %v3493_v37 }
 0x43c   : > { %2739 = vmatpush3.bf16.msra.mxu0 %v3964_v60 }
 0x43d   : > { %2740 = vmatprep.subr.bf16.mxu0 %v3493_v37 }
 0x440   : > { %2741 = vmatpush3.bf16.msra.mxu0 %v3977_v20 }
 0x441   : > { %2742 = vmatprep.subr.bf16.mxu0 %v3493_v37 }
 0x444   : > { %2743 = vmatpush3.bf16.msra.mxu0 %v3974_v15 }
 0x445   : > { %2744 = vmatprep.subr.bf16.mxu0 %v3493_v37 }
 0x448   : > { %2745 = vmatpush3.bf16.msra.mxu0 %v3987_v36 }
 0x449   : > { %2746 = vmatprep.subr.bf16.mxu0 %v3493_v37 }
 0x44c   : > { %2747 = vmatpush3.bf16.msra.mxu0 %v3984_v32 }
 0x44d   : > { %2748 = vmatprep.subr.bf16.mxu0 %v3493_v37 }
 0x450   : > { %2749 = vmatpush3.bf16.msra.mxu0 %v4003_v56 }
 0x451   : > { %2750 = vmatprep.subr.bf16.mxu0 %v3493_v37 }
 0x454   : > { %2751 = vmatpush3.bf16.msra.mxu0 %v4000_v53 }
 0x455   : > { %2776 = vmatprep.subr.bf16.mxu0 %v3493_v37 }
 0x463   : > { %v1448_v60 = vpop.xlane.xlu0 %1447 }
 0x464   : > { %3186 = vrcp.f32 %v1448_v60  ;;  %v3005_v60 = vld [vmem:[#allocation10 + $0x10] sm:$0xff]  }
 0x467   : > { %v1450_v0 = vpop.xlane.xlu1 %1449 }
 0x468   : > { %v1452_v15 = vpop.xlane.xlu0 %1451  ;;  %3188 = vrcp.f32 %v1450_v0  ;;  %v3006_v0 = vld [vmem:[#allocation10 + $0x18] sm:$0xff]  }
 0x469   : > { %3190 = vrcp.f32 %v1452_v15  ;;  %v3007_v15 = vld [vmem:[#allocation10 + $0x20] sm:$0xff]  }
 0x46b   : > { %v1454_v20 = vpop.xlane.xlu1 %1453 }
 0x46c   : > { %3192 = vrcp.f32 %v1454_v20  ;;  %v3008_v20 = vld [vmem:[#allocation10 + $0x28] sm:$0xff]  }
 0x46e   : > { %v3187_v36 = vpop.eup %3186 }
 0x46f   : > { %v1469_v59 = vmul.f32 %v3187_v36, %v3171_v11  ;;  %v3014_v11 = vld [vmem:[#allocation13] ss:$8 sps:$4 sm:$0xff]   ;;  %v3009_v36 = vld [vmem:[#allocation10 + $0x30] sm:$0xff]  }
 0x472   : > { %v3189_v32 = vpop.eup %3188 }
 0x473   : > { %v1470_v61 = vmul.f32 %v3189_v32, %v3173_v13  ;;  %v3191_v16 = vpop.eup %3190  ;;  %v3016_v13 = vld [vmem:[#allocation13 + $0x4] ss:$8 sps:$4 sm:$0xff]   ;;  %v3010_v32 = vld [vmem:[#allocation10 + $0x38] sm:$0xff]  }
 0x474   : > { %v1471_v30 = vmul.f32 %v3191_v16, %v3175_v18  ;;  %v3019_v18 = vld [vmem:[#allocation13 + $0x14] ss:$8 sps:$4 sm:$0xff]  }
 0x475   : > { %v1476_v56 = vpack.c.bf16 %v1470_v61, %v1469_v59 }
 0x476   : > { %v3193_v19 = vpop.eup %3192 }
 0x477   : > { %2753 = vmatmul.mubr.bf16.vlgmr.msra.gmra.mrb[72].mxu0 %v1476_v56  ;;  %v1472_v53 = vmul.f32 %v3193_v19, %v3177_v10  ;;  %v3017_v10 = vld [vmem:[#allocation13 + $0x10] ss:$8 sps:$4 sm:$0xff]   ;;  %v2379_v56 = vcombine.low %v3995_v48, %v3998_v50  ;;  %v3031_v50 = vld [vmem:[#allocation13 + $0x54] ss:$8 sps:$4 sm:$0xff]  }
 0x478   : > { %2777 = vmatpush3.bf16.msra.mxu0 %v4064_v43  ;;  %2792 = vmatprep.mubr.msk.bf16.mxu0 %vm3494_vm0, %v3493_v37  ;;  %v2995_v43 = vld [vmem:[#allocation12] sm:$0xff]   ;;  %v3029_v48 = vld [vmem:[#allocation13 + $0x50] ss:$8 sps:$4 sm:$0xff]  }
 0x479   : > { %2778 = vmatprep.subr.bf16.mxu0 %v3493_v37  ;;  %v1477_v49 = vpack.c.bf16 %v1472_v53, %v1471_v30  ;;  %2796 = vmatprep.subr.bf16.mxu1 %v2995_v43  ;;  %v2381_v53 = vcombine.low %v4095_v39, %v4098_v42  ;;  %v3035_v39 = vld [vmem:[#allocation13 + $0x70] ss:$8 sps:$4 sm:$0xff]  }
 0x47b   : > { %2773 = vmatmul.mubr.bf16.vlgmr.msra.gmra.mrb[12].mxu1 %v1477_v49  ;;  %v2382_v49 = vcombine.low %v4147_v63, %v4150_v2 }
 0x47c   : > { %2779 = vmatpush3.bf16.msra.mxu0 %v4062_v40  ;;  %v2996_v40 = vld [vmem:[#allocation12 + $0x8] sm:$0xff]   ;;  %2797 = vmatpush3.bf16.msra.mxu1 %v2995_v43 }
 0x47d   : > { %2780 = vmatprep.subr.bf16.mxu0 %v3493_v37  ;;  %2798 = vmatprep.subr.bf16.mxu1 %v2996_v40  ;;  %v3028_v43 = vld [vmem:[#allocation13 + $0x44] ss:$8 sps:$4 sm:$0xff]  }
 0x480   : > { %2781 = vmatpush3.bf16.msra.mxu0 %v4076_v8  ;;  %2799 = vmatpush3.bf16.msra.mxu1 %v2996_v40  ;;  %v2998_v8 = vld [vmem:[#allocation12 + $0x18] sm:$0xff]   ;;  %v3026_v40 = vld [vmem:[#allocation13 + $0x40] ss:$8 sps:$4 sm:$0xff]  }
 0x481   : > { %2782 = vmatprep.subr.bf16.mxu0 %v3493_v37 }
 0x484   : > { %2783 = vmatpush3.bf16.msra.mxu0 %v4074_v5  ;;  %v2997_v5 = vld [vmem:[#allocation12 + $0x10] sm:$0xff]  }
 0x485   : > { %2784 = vmatprep.subr.bf16.mxu0 %v3493_v37  ;;  %2800 = vmatprep.subr.bf16.mxu1 %v2997_v5 }
 0x486   : > { %2801 = vmatpush3.bf16.msra.mxu1 %v2997_v5  ;;  %v3034_v5 = vld [vmem:[#allocation13 + $0x64] ss:$8 sps:$4 sm:$0xff]  }
 0x487   : > { %2802 = vmatprep.subr.bf16.mxu1 %v2998_v8 }
 0x488   : > { %2785 = vmatpush3.bf16.msra.mxu0 %v4088_v29  ;;  %v3000_v29 = vld [vmem:[#allocation12 + $0x28] sm:$0xff]  }
 0x489   : > { %2786 = vmatprep.subr.bf16.mxu0 %v3493_v37 }
 0x48a   : > { %2803 = vmatpush3.bf16.msra.mxu1 %v2998_v8  ;;  %v3032_v8 = vld [vmem:[#allocation13 + $0x60] ss:$8 sps:$4 sm:$0xff]  }
 0x48c   : > { %2787 = vmatpush3.bf16.msra.mxu0 %v4086_v28  ;;  %v2999_v28 = vld [vmem:[#allocation12 + $0x20] sm:$0xff]  }
 0x48d   : > { %2788 = vmatprep.subr.bf16.mxu0 %v3493_v37  ;;  %2804 = vmatprep.subr.bf16.mxu1 %v2999_v28 }
 0x48e   : > { %2805 = vmatpush3.bf16.msra.mxu1 %v2999_v28 }
 0x48f   : > { %2806 = vmatprep.subr.bf16.mxu1 %v3000_v29 }
 0x490   : > { %2789 = vmatpush3.bf16.msra.mxu0 %v4103_v51  ;;  %v3001_v51 = vld [vmem:[#allocation12 + $0x30] sm:$0xff]  }
 0x491   : > { %2790 = vmatprep.subr.bf16.mxu0 %v3493_v37 }
 0x492   : > { %2807 = vmatpush3.bf16.msra.mxu1 %v3000_v29 }
 0x493   : > { %2808 = vmatprep.subr.bf16.mxu1 %v3001_v51 }
 0x494   : > { %2791 = vmatpush3.bf16.msra.mxu0 %v4100_v45 }
 0x495   : > { %2064 = vmatprep.subr.bf16.mxu0 %v3016_v13 }
 0x496   : > { %2809 = vmatpush3.bf16.msra.mxu1 %v3001_v51 }
 0x497   : > { %2810 = vmatprep.subr.bf16.mxu1 %v3002_v17 }
 0x49a   : > { %2811 = vmatpush3.bf16.msra.mxu1 %v3002_v17 }
 0x49b   : > { %2820 = vmatprep.subr.bf16.mxu1 %v3003_v21 }
 0x4a3   : > { %v1456_v46 = vpop.xlane.xlu0 %1455 }
 0x4a4   : > { %3194 = vrcp.f32 %v1456_v46 }
 0x4a5   : > { %v1458_v37 = vpop.xlane.xlu1 %1457 }
 0x4a6   : > { %3196 = vrcp.f32 %v1458_v37 }
 0x4ae   : > { %v3195_v45 = vpop.eup %3194 }
 0x4af   : > { %v1473_v31 = vmul.f32 %v3195_v45, %v4189_v26 }
 0x4b0   : > { %v3197_v12 = vpop.eup %3196 }
 0x4b1   : > { %v1474_v35 = vmul.f32 %v3197_v12, %v4192_v41 }
 0x4b3   : > { %v1478_v55 = vpack.c.bf16 %v1474_v35, %v1473_v31 }
 0x4b5   : > { %2793 = vmatmul.mubr.bf16.vlgmr.msra.gmra.mrb[76].mxu0 %v1478_v55 }
 0x4b6   : > { %2065 = vmatpush1.bf16.msra.mxu0 %v3014_v11  ;;  %2096 = vmatprep.mubr.bf16.mxu0 %v3495_v4 }
 0x4b7   : > { %2066 = vmatprep.subr.bf16.mxu0 %v3019_v18 }
 0x4ba   : > { %2067 = vmatpush1.bf16.msra.mxu0 %v3017_v10 }
 0x4bb   : > { %2068 = vmatprep.subr.bf16.mxu0 %v3022_v9 }
 0x4be   : > { %2069 = vmatpush1.bf16.msra.mxu0 %v3020_v22 }
 0x4bf   : > { %2070 = vmatprep.subr.bf16.mxu0 %v3025_v23 }
 0x4c2   : > { %2071 = vmatpush1.bf16.msra.mxu0 %v3023_v24 }
 0x4c3   : > { %2072 = vmatprep.subr.bf16.mxu0 %v3028_v43 }
 0x4c6   : > { %2073 = vmatpush1.bf16.msra.mxu0 %v3026_v40 }
 0x4c7   : > { %2074 = vmatprep.subr.bf16.mxu0 %v3031_v50 }
 0x4ca   : > { %2075 = vmatpush1.bf16.msra.mxu0 %v3029_v48 }
 0x4cb   : > { %2076 = vmatprep.subr.bf16.mxu0 %v3034_v5 }
 0x4ce   : > { %2077 = vmatpush1.bf16.msra.mxu0 %v3032_v8 }
 0x4cf   : > { %2078 = vmatprep.subr.bf16.mxu0 %v3037_v3 }
 0x4d2   : > { %2079 = vmatpush1.bf16.msra.mxu0 %v3035_v39 }
 0x50a   : > { %v1513_v62 = vpop.f32.mrb[68].mxu0 }
 0x50b   : > { %v2734_v14 = vpop.f32.mrb[69].mxu0 }
 0x50c   : > { %v1516_v1 = vpop.f32.mrb[70].mxu0 }
 0x50d   : > { %v1643_v6 = vpack.c.bf16 %v1516_v1, %v1513_v62  ;;  %v2735_v58 = vpop.f32.mrb[71].mxu0 }
 0x50f   : > { %2812 = vmatprep.mubr.bf16.mxu1 %v1643_v6 }
 0x54a   : > { %v1554_v25 = vpop.f32.mrb[72].mxu0 }
 0x54b   : > { %v2754_v27 = vpop.f32.mrb[73].mxu0 }
 0x54c   : > { %v1557_v26 = vpop.f32.mrb[74].mxu0 }
 0x54d   : > { %v1644_v41 = vpack.c.bf16 %v1557_v26, %v1554_v25  ;;  %v2755_v34 = vpop.f32.mrb[75].mxu0  ;;  %v1975_v25 = vshrl.u32 %v1377_v33, 7  ;;  %v1972_v26 = vld [vmem:[%s4327_s9] sm:$0x3] }
 0x54e   : > { %v1595_v52 = vpop.f32.mrb[12].mxu1 }
 0x54f   : > { %v2774_v38 = vpop.f32.mrb[13].mxu1  ;;  %2813 = vmatmul.mubr.bf16.vlgmr.msra.gmra.mrb[16].mxu1 %v1644_v41  ;;  %v1976_v27 = vsub.s32 0, %v1975_v25  ;;  %v1980_v41 = vsub.s32 1, %v1975_v25 }
 0x550   : > { %v1598_v54 = vpop.f32.mrb[14].mxu1  ;;  %2821 = vmatpush3.bf16.msra.mxu1 %v3003_v21 }
 0x551   : > { %v1645_v57 = vpack.c.bf16 %v1598_v54, %v1595_v52  ;;  %v2775_v47 = vpop.f32.mrb[15].mxu1  ;;  %2822 = vmatprep.subr.bf16.mxu1 %v3004_v44  ;;  %v1977_v34 = vrot.slane %v1972_v26, %v1976_v27 }
 0x553   : > { %2816 = vmatprep.mubr.bf16.mxu1 %v1645_v57 }
 0x554   : > { %2823 = vmatpush3.bf16.msra.mxu1 %v3004_v44  ;;  %v1981_v44 = vrot.slane %v1972_v26, %v1980_v41 }
 0x555   : > { %2824 = vmatprep.subr.bf16.mxu1 %v3005_v60 }
 0x558   : > { %2825 = vmatpush3.bf16.msra.mxu1 %v3005_v60 }
 0x559   : > { %2826 = vmatprep.subr.bf16.mxu1 %v3006_v0 }
 0x55c   : > { %2827 = vmatpush3.bf16.msra.mxu1 %v3006_v0 }
 0x55d   : > { %2828 = vmatprep.subr.bf16.mxu1 %v3007_v15 }
 0x560   : > { %2829 = vmatpush3.bf16.msra.mxu1 %v3007_v15 }
 0x561   : > { %2830 = vmatprep.subr.bf16.mxu1 %v3008_v20 }
 0x564   : > { %2831 = vmatpush3.bf16.msra.mxu1 %v3008_v20 }
 0x565   : > { %2832 = vmatprep.subr.bf16.mxu1 %v3009_v36 }
 0x568   : > { %2833 = vmatpush3.bf16.msra.mxu1 %v3009_v36 }
 0x569   : > { %2834 = vmatprep.subr.bf16.mxu1 %v3010_v32 }
 0x56c   : > { %2835 = vmatpush3.bf16.msra.mxu1 %v3010_v32 }
 0x588   : > { %v1636_v59 = vpop.f32.mrb[76].mxu0 }
 0x589   : > { %v2794_v61 = vpop.f32.mrb[77].mxu0 }
 0x58a   : > { %v1639_v16 = vpop.f32.mrb[78].mxu0 }
 0x58b   : > { %v1646_v19 = vpack.c.bf16 %v1639_v16, %v1636_v59  ;;  %v2795_v30 = vpop.f32.mrb[79].mxu0 }
 0x58d   : > { %2817 = vmatmul.mubr.bf16.gmra.mrb[20].mxu1 %v1646_v19 }
 0x58e   : > { %2836 = vmatprep.mubr.bf16.mxu1 %v2379_v56 }
 0x595   : > { %2837 = vmatmul.mubr.bf16.vlgmr.msra.gmra.mrb[16].mxu1 %v2380_v7  ;;  %v2391_v7 = vld [vmem:[%s4325_s7] ss:$0 sm:$0xff] }
 0x596   : > { %2840 = vmatprep.mubr.bf16.mxu1 %v2381_v53 }
 0x59d   : > { %2841 = vmatmul.mubr.bf16.gmra.mrb[20].mxu1 %v2382_v49 }
 0x668   : > { %v2838_v42 = vpop.f32.mrb[16].mxu1 }
 0x669   : > { %v1938_v63 = vadd.f32 %v2838_v42, %v2391_v7  ;;  %v1898_v2 = vpop.f32.mrb[17].mxu1 }
 0x66a   : > { %v1936_v28 = vadd.f32 %v2391_v7, %v1898_v2  ;;  %v2839_v29 = vpop.f32.mrb[18].mxu1 }
 0x66b   : > { %3198 = vtanh.f32 %v1938_v63  ;;  %v1939_v46 = vadd.f32 %v2839_v29, %v2391_v7  ;;  %v1901_v51 = vpop.f32.mrb[19].mxu1 }
 0x66c   : > { %3200 = vtanh.f32 %v1936_v28  ;;  %v1937_v37 = vadd.f32 %v2391_v7, %v1901_v51 }
 0x66d   : > { %3202 = vtanh.f32 %v1939_v46 }
 0x66e   : > { %3204 = vtanh.f32 %v1937_v37 }
 0x670   : > { %v2842_v45 = vpop.f32.mrb[20].mxu1 }
 0x671   : > { %v1942_v12 = vadd.f32 %v2842_v45, %v2391_v7  ;;  %v1914_v31 = vpop.f32.mrb[21].mxu1 }
 0x672   : > { %v1940_v35 = vadd.f32 %v2391_v7, %v1914_v31  ;;  %v2843_v55 = vpop.f32.mrb[22].mxu1 }
 0x673   : > { %3206 = vtanh.f32 %v1942_v12  ;;  %v1943_v17 = vadd.f32 %v2843_v55, %v2391_v7  ;;  %v1917_v21 = vpop.f32.mrb[23].mxu1 }
 0x674   : > { %3208 = vtanh.f32 %v1940_v35  ;;  %v1941_v62 = vadd.f32 %v2391_v7, %v1917_v21 }
 0x675   : > { %v3199_v14 = vpop.eup %3198  ;;  %3210 = vtanh.f32 %v1943_v17 }
 0x676   : > { %v3201_v1 = vpop.eup %3200  ;;  %3212 = vtanh.f32 %v1941_v62 }
 0x677   : > { %v3203_v6 = vpop.eup %3202 }
 0x678   : > { %v3205_v58 = vpop.eup %3204  ;;  %v1953_v11 = vpack.c.bf16 %v3203_v6, %v3199_v14 }
 0x679   : > { %v1952_v13 = vpack.c.bf16 %v3205_v58, %v3201_v1 }
 0x67b   : > { %2097 = vmatmul.mubr.bf16.vlgmr.msra.gmra.mrb[80].mxu0 %v1952_v13 }
 0x67c   : > { %2106 = vmatprep.mubr.bf16.mxu0 %v3495_v4 }
 0x67d   : > { %v3207_v18 = vpop.eup %3206 }
 0x67e   : > { %v3209_v10 = vpop.eup %3208 }
 0x67f   : > { %v3211_v9 = vpop.eup %3210 }
 0x680   : > { %v3213_v22 = vpop.eup %3212  ;;  %v1955_v23 = vpack.c.bf16 %v3211_v9, %v3207_v18 }
 0x681   : > { %v1954_v24 = vpack.c.bf16 %v3213_v22, %v3209_v10 }
 0x683   : > { %2107 = vmatmul.mubr.bf16.gmra.mrb[84].mxu0 %v1953_v11 }
 0x684   : > { %2116 = vmatprep.mubr.bf16.mxu0 %v3495_v4 }
 0x68b   : > { %2117 = vmatmul.mubr.bf16.gmra.mrb[88].mxu0 %v1954_v24 }
 0x68c   : > { %2126 = vmatprep.mubr.bf16.mxu0 %v3495_v4 }
 0x693   : > { %2127 = vmatmul.mubr.bf16.gmra.mrb[92].mxu0 %v1955_v23 }
 0x74e   : > { %v2098_v52 = vpop.f32.mrb[80].mxu0 }
 0x74f   : > { %v2099_v38 = vadd.f32 %v2098_v52, %v1977_v34  ;;  %v2100_v54 = vpop.f32.mrb[81].mxu0 }
 0x750   : > { %v2101_v57 = vadd.f32 %v2100_v54, %v1981_v44  ;;  %v2102_v47 = vpop.f32.mrb[82].mxu0 }
 0x751   : > { %2137 = vst [vmem:[%s4249_s5] sm:$0xff] %v2099_v38  ;;  %v2103_v33 = vadd.f32 %v2102_v47, %v1977_v34  ;;  %v2104_v60 = vpop.f32.mrb[83].mxu0 }
 0x752   : > { %2138 = vst [vmem:[%s4249_s5 + $0x8] sm:$0xff] %v2101_v57  ;;  %v2105_v0 = vadd.f32 %v2104_v60, %v1981_v44 }
 0x753   : > { %2139 = vst [vmem:[%s4249_s5 + $0x10] sm:$0xff] %v2103_v33 }
 0x754   : > { %2140 = vst [vmem:[%s4249_s5 + $0x18] sm:$0xff] %v2105_v0 }
 0x756   : > { %v2108_v15 = vpop.f32.mrb[84].mxu0 }
 0x757   : > { %v2109_v20 = vadd.f32 %v2108_v15, %v1977_v34  ;;  %v2110_v36 = vpop.f32.mrb[85].mxu0 }
 0x758   : > { %v2111_v32 = vadd.f32 %v2110_v36, %v1981_v44  ;;  %v2112_v59 = vpop.f32.mrb[86].mxu0 }
 0x759   : > { %2141 = vst [vmem:[%s4249_s5 + $0x20] sm:$0xff] %v2109_v20  ;;  %v2113_v61 = vadd.f32 %v2112_v59, %v1977_v34  ;;  %v2114_v16 = vpop.f32.mrb[87].mxu0 }
 0x75a   : > { %2142 = vst [vmem:[%s4249_s5 + $0x28] sm:$0xff] %v2111_v32  ;;  %v2115_v56 = vadd.f32 %v2114_v16, %v1981_v44 }
 0x75b   : > { %2143 = vst [vmem:[%s4249_s5 + $0x30] sm:$0xff] %v2113_v61 }
 0x75c   : > { %2144 = vst [vmem:[%s4249_s5 + $0x38] sm:$0xff] %v2115_v56 }
 0x75e   : > { %v2118_v19 = vpop.f32.mrb[88].mxu0 }
 0x75f   : > { %v2119_v30 = vadd.f32 %v2118_v19, %v1977_v34  ;;  %v2120_v53 = vpop.f32.mrb[89].mxu0 }
 0x760   : > { %v2121_v49 = vadd.f32 %v2120_v53, %v1981_v44  ;;  %v2122_v43 = vpop.f32.mrb[90].mxu0 }
 0x761   : > { %2145 = vst [vmem:[%s4249_s5 + $0x40] sm:$0xff] %v2119_v30  ;;  %v2123_v40 = vadd.f32 %v2122_v43, %v1977_v34  ;;  %v2124_v48 = vpop.f32.mrb[91].mxu0 }
 0x762   : > { %2146 = vst [vmem:[%s4249_s5 + $0x48] sm:$0xff] %v2121_v49  ;;  %v2125_v50 = vadd.f32 %v2124_v48, %v1981_v44 }
 0x763   : > { %2147 = vst [vmem:[%s4249_s5 + $0x50] sm:$0xff] %v2123_v40 }
 0x764   : > { %2148 = vst [vmem:[%s4249_s5 + $0x58] sm:$0xff] %v2125_v50 }
 0x766   : > { %v2128_v5 = vpop.f32.mrb[92].mxu0 }
 0x767   : > { %v2129_v8 = vadd.f32 %v2128_v5, %v1977_v34  ;;  %v2130_v39 = vpop.f32.mrb[93].mxu0 }
 0x768   : > { %v2131_v3 = vadd.f32 %v2130_v39, %v1981_v44  ;;  %v2132_v4 = vpop.f32.mrb[94].mxu0 }
 0x769   : > { %2149 = vst [vmem:[%s4249_s5 + $0x60] sm:$0xff] %v2129_v8  ;;  %v2133_v7 = vadd.f32 %v2132_v4, %v1977_v34  ;;  %v2134_v42 = vpop.f32.mrb[95].mxu0 }
 0x76a   : > { %2150 = vst [vmem:[%s4249_s5 + $0x68] sm:$0xff] %v2131_v3  ;;  %v2135_v63 = vadd.f32 %v2134_v42, %v1981_v44 }
 0x76b   : > { %2151 = vst [vmem:[%s4249_s5 + $0x70] sm:$0xff] %v2133_v7 }
 0x76c   : > { %2152 = vst [vmem:[%s4249_s5 + $0x78] sm:$0xff] %v2135_v63 }
 0x76d   : > { %3409 = shalt.err (!%p3406_p11)
}
 0x76e   : > { %s3410_s22 = scalar_lea.hbm %s4269_s16, 2048  ;;  %s3414_s19 = scalar_lea.hbm %s4371_s17, 4096 }
 0x76f   : > { %p3411_p0 = scmp.ne.s32.totalorder %s4269_s16, %s3410_s22  ;;  %p3415_p4 = scmp.lt.u32.totalorder %s4269_s16, %s4371_s17 }
 0x770   : > { %p3416_p5 = scmp.lt.u32.totalorder %s3414_s19, %s3410_s22  ;;  %p3418_p3 = scmp.lt.u32.totalorder %s3410_s22, %s4269_s16 }
 0x771   : > { %p3412_p10 = pnand %p3411_p0, %p3737_p6 }
 0x772   : > { %p3417_p2 = por %p3416_p5, %p3415_p4 }
 0x773   : > { %p3413_p1 = pneg %p3412_p10 }
 0x774   : > { %p3419_p7 = por %p3418_p3, %p3417_p2 }
 0x776   : > { %p3420_p9 = pnand %p3419_p7, %p3413_p1 }
 0x778   : > { %3423 = shalt.err (!%p3420_p9)
}
 0x779   : > { %s3497_s1 = smov 256   ;;  %s3498_s5 = smov 16  }
 0x77a   : > { %2872 = dma.vmem_to_hbm [thread:$0]  (%p3737_p6), %s4271_s23, 2048, %s4269_s16, %s2154_s0, %s3497_s1, %s3497_s1, %s3498_s5  }
 0x77b PF: > { %s4372_s30 = sld [smem:[#allocation23_spill]]  ;;  %s4373_s28 = sld [smem:[#allocation24_spill]] }
 0x77c   : > { %p4375_p8 = scmp.ge.s32.totalorder %s3480_s26, 2 }
 0x781   : > { %s2183_s12 = sand.u32 1, %s4372_s30   ;;  %p4374_p13 = scmp.ne.s32.totalorder %s4373_s28, 0 }
 0x782   : > { %s2184_s13 = scalar_lea.sflag [#allocation6], %s2183_s12 }
 0x783   : > { %p2895_p12 = pnand %p4375_p8, %p4374_p13 }
 0x785   : > { %3463 = dma.done.wait (!%p2895_p12), %s2184_s13, 2048  }
 0x786   : > { %3465 = vsyncadd (!%p2895_p12), %s2184_s13, 4294965248  ;;  %p32_p11 = scmp.ge.s32.totalorder %s3724_s20, 4   ;;  %s4376_s23 = smov %s3472_s24 }
 0x787   : > { %s4377_s24 = smov %s3476_s25  ;;  %s4378_s25 = smov %s3733_s11 }
 0x788   : > { %s4379_s26 = smov %s3724_s20  ;;  %34 = sbr.rel (!%p32_p11) target bundleno = 22 (0x16), region = 130 }
 0x78f   :  { %2189 = vsyncpa [#allocation5], 1 }
 0x790   :  { %2191 = vsyncpa [#allocation5 + $0x1], 1 }
 0x791   :  { %2192 = vsyncpa [#allocation8], 1 }
 0x792   :  { %2194 = vsyncpa [#allocation8 + $0x1], 1 }
 0x793   :  { %2195 = vsyncpa [#allocation11], 1 }
 0x794   :  { %2196 = vsyncpa [#allocation14], 1 }
 0x795   :  { %2197 = vsyncpa [#allocation6], 1 }
 0x796   :  { %2199 = vsyncpa [#allocation6 + $0x1], 1 }

</bundles_post_ra>
